<compile_context>
chip_gen: v7x
topology: tpu7x:2x2x1
jax: 0.10.0
libtpu: 0.0.40
codegen_flags: <defaults>
</compile_context>

<pallas_src>
import functools

import jax
import jax.numpy as jnp
from jax.experimental import pallas as pl
from jax.experimental.pallas import tpu as pltpu


def _ref_volume_kernel(params_ref, pts_ref, vol_ref, d_ref, h_ref, w_ref,
                       out_ref, *, C, D, Hv, Wv):
    """One tile of points -> NDC projection + separable trilinear grid_sample.

    params (f32, SMEM), flat layout:
      [0:12]  P = K @ w2c[:3, :4]  (row-major 3x4, folded projection)
      [12] ax = (Wv-1)*sx/(W-1)   [13] bx = (Wv-1)*ox
      [14] ay = (Hv-1)*sy/(H-1)   [15] by = (Hv-1)*oy
      [16] az = (D-1)/(far-near)  [17] bz = -near*(D-1)/(far-near)

    pts_ref : [3, tN]        world points, lane-dense
    vol_ref : [Wv*C, D*Hv]   volT[(w,c),(d,h)] = vol[c,d,h,w]  (bf16 or f32)
    d_ref   : [D, 1]   h_ref : [Hv, 1]   w_ref : [Wv, 1]   voxel coords (f32)
    out_ref : [C, tN]
    """
    p = params_ref
    pts = pts_ref[...]                          # [3, tN] f32
    px = pts[0:1, :]
    py = pts[1:2, :]
    pz = pts[2:3, :]

    # Folded projection: pix = P @ [p; 1].
    ix = p[0] * px + p[1] * py + p[2] * pz + p[3]
    iy = p[4] * px + p[5] * py + p[6] * pz + p[7]
    iz = p[8] * px + p[9] * py + p[10] * pz + p[11]

    # Sign-preserving clamp away from 0, then the EXACT EUP reciprocal
    # (approx=True was the v2 accuracy bug).
    iz_safe = jnp.where(iz >= 0.0, jnp.maximum(iz, 1e-8), jnp.minimum(iz, -1e-8))
    inv_iz = pl.reciprocal(iz_safe, approx=False)

    # Un-normalized grid_sample coordinates (align_corners=True: u = ndc*(size-1));
    # all NDC / pad constants are pre-folded into p[12:18].
    ux = ix * inv_iz * p[12] + p[13]            # -> W axis
    uy = iy * inv_iz * p[14] + p[15]            # -> H axis
    uz = iz * p[16] + p[17]                     # -> D axis

    # hat(u, i) = relu(1 - |u - i|) reproduces the bilinear weights + zero
    # padding of grid_sample(align_corners=True, padding_mode='zeros') exactly.
    hatz = jnp.maximum(0.0, 1.0 - jnp.abs(uz - d_ref[...]))     # [D,  tN]
    haty = jnp.maximum(0.0, 1.0 - jnp.abs(uy - h_ref[...]))     # [Hv, tN]
    hatx = jnp.maximum(0.0, 1.0 - jnp.abs(ux - w_ref[...]))     # [Wv, tN]
    # TODO(synk): on v6e/v7x (bf16 VALU) build hatz/haty/hatx directly in
    # bfloat16 to halve the weight-build issue count; keep f32 on v5e.

    tN = pts.shape[1]
    # zy[(d,h), n] = hatZ[d,n] * hatY[h,n]: one full-size multiply via sublane
    # broadcast; Hv multiple of 8 keeps the reshape layout-preserving.
    zy = (hatz[:, None, :] * haty[None, :, :]).reshape(D * Hv, tN)

    # Stage 1 (MXU, bf16 x bf16 -> f32 accumulate): T[(w,c),n] = sum_{d,h} vol*zy.
    t = jnp.dot(vol_ref[...], zy.astype(vol_ref.dtype),
                preferred_element_type=jnp.float32)             # [Wv*C, tN]

    # Stage 2: hoisted hatX expansion (one sublane repeat + one multiply),
    # then reduce the Wv taps with an unrolled add chain of [C, tN] slices
    # (C multiple of 8 keeps each slice sublane-tile aligned).
    hatx_rep = jnp.broadcast_to(hatx[:, None, :], (Wv, C, tN)).reshape(Wv * C, tN)
    weighted = t * hatx_rep
    feat = weighted[0:C, :]
    for w in range(1, Wv):
        feat = feat + weighted[w * C:(w + 1) * C, :]

    out_ref[...] = feat.astype(out_ref.dtype)                   # lane-dense store


def precompute_ref_volume(feat_volume, vol_dtype=jnp.bfloat16):
    """One-time volume layout: volT[(w,c),(d,h)] = vol[c,d,h,w].

    Loop-invariant across forward calls -> do it once at parameter-init time
    instead of inside the per-call wrapper.
    """
    _, C, D, Hv, Wv = feat_volume.shape
    return (jnp.transpose(feat_volume[0], (3, 0, 1, 2))
            .reshape(Wv * C, D * Hv).astype(vol_dtype))


def ref_volume_forward(feat_volume, shape, point_samples, pose_ref,
                       depth_range=None, pad=0, tile_n=1024,
                       vol_dtype=jnp.bfloat16, volT=None):
    """Pallas implementation of RefVolume.forward.

    feat_volume:   [1, C, D, Hv, Wv] (the nn.Parameter)
    shape:         anything with shape[-2] = image H, shape[-1] = image W
    point_samples: [N_ray, N_sample, 3] world-space points
    returns:       [N_ray, N_sample, C] (degenerate dims squeezed, as in PyTorch)
    """
    _, C, D, Hv, Wv = feat_volume.shape
    N_ray, N_sample = point_samples.shape[0], point_samples.shape[1]
    H, W = shape[-2], shape[-1]
    DH, WC = D * Hv, Wv * C

    near, far = pose_ref['near_fars'][0], pose_ref['near_fars'][1]
    if depth_range is not None:
        # TODO(synk): depth_range assumed to override (near, far) as in get_ndc_coordinate.
        near, far = depth_range[0], depth_range[1]
    near = jnp.asarray(near, jnp.float32)
    far = jnp.asarray(far, jnp.float32)
    w2c, K = pose_ref['w2cs'][0], pose_ref['intrinsics'][0]

    if pad > 0:
        W_feat, H_feat = W / 4.0, H / 4.0      # (inv_scale + 1) / 4
        sx, ox = W_feat / (W_feat + 2 * pad), pad / (W_feat + 2 * pad)
        sy, oy = H_feat / (H_feat + 2 * pad), pad / (H_feat + 2 * pad)
    else:
        sx, ox, sy, oy = 1.0, 0.0, 1.0, 0.0

    # Fold the camera chain into a single 3x4 matrix and pre-fold the NDC /
    # align_corners constants (removes ~20 [1,tN] VALU ops from the kernel).
    P = jnp.matmul(K[:3, :3].astype(jnp.float32),
                   w2c[:3, :4].astype(jnp.float32))              # [3, 4]
    az = (D - 1) / (far - near)
    consts = jnp.stack([
        jnp.asarray((Wv - 1) * sx / (W - 1), jnp.float32),
        jnp.asarray((Wv - 1) * ox, jnp.float32),
        jnp.asarray((Hv - 1) * sy / (H - 1), jnp.float32),
        jnp.asarray((Hv - 1) * oy, jnp.float32),
        az.astype(jnp.float32),
        (-near * az).astype(jnp.float32),
    ])
    params = jnp.concatenate([P.reshape(-1), consts])            # [18] f32

    if volT is None:
        volT = precompute_ref_volume(feat_volume, vol_dtype)

    # Tiny loop-invariant voxel-coordinate columns (loaded once, revisited).
    d_col = jnp.arange(D, dtype=jnp.float32)[:, None]            # [D, 1]
    h_col = jnp.arange(Hv, dtype=jnp.float32)[:, None]           # [Hv, 1]
    w_col = jnp.arange(Wv, dtype=jnp.float32)[:, None]           # [Wv, 1]

    # Points, lane-dense: [3, Np] with Np a multiple of tile_n.
    pts = point_samples.reshape(-1, 3).astype(jnp.float32)
    N = pts.shape[0]
    Np = ((N + tile_n - 1) // tile_n) * tile_n
    if Np != N:
        pts = jnp.pad(pts, ((0, Np - N), (0, 0)))
    pts_t = pts.T                                                # [3, Np]

    kernel = functools.partial(_ref_volume_kernel, C=C, D=D, Hv=Hv, Wv=Wv)
    # TODO(synk): for production-scale volumes (D*Hv*Wv >> VMEM) slab volT over
    # (d,h) on a trailing "arbitrary" grid axis (contraction slab a multiple of
    # 256 on v6e/v7x, 128 on v5e), single-buffer the constant-index blocks
    # (pl.Buffered(1)) and budget the slab for v7x's 64 MiB VMEM.
    out = pl.pallas_call(
        kernel,
        out_shape=jax.ShapeDtypeStruct((C, Np), feat_volume.dtype),
        grid=(Np // tile_n,),
        in_specs=[
            pl.BlockSpec(memory_space=pltpu.MemorySpace.SMEM),   # folded params
            pl.BlockSpec((3, tile_n), lambda i: (0, i)),         # point tile (lane-dense)
            pl.BlockSpec((WC, DH), lambda i: (0, 0)),            # volume, VMEM-resident
            pl.BlockSpec((D, 1), lambda i: (0, 0)),              # d coord column
            pl.BlockSpec((Hv, 1), lambda i: (0, 0)),             # h coord column
            pl.BlockSpec((Wv, 1), lambda i: (0, 0)),             # w coord column
        ],
        out_specs=pl.BlockSpec((C, tile_n), lambda i: (0, i)),   # lane-dense output
        compiler_params=pltpu.CompilerParams(
            dimension_semantics=("parallel",),
            vmem_limit_bytes=32 * 1024 * 1024),
    )(params, pts_t, volT, d_col, h_col, w_col)

    out = out[:, :N].T.reshape(N_ray, N_sample, C)
    # PyTorch forward ends with `.squeeze()`; mimic for degenerate dims.
    if N_ray == 1 or N_sample == 1 or C == 1:
        out = jnp.squeeze(out)
    return out


def ref_volume_forward_jax(feat_volume, shape, point_samples, pose_ref,
                           depth_range=None, pad=0):
    """Pure-JAX reference (explicit gather-based grid_sample) for validation."""
    _, C, D, Hv, Wv = feat_volume.shape
    H, W = shape[-2], shape[-1]
    near, far = pose_ref['near_fars'][0], pose_ref['near_fars'][1]
    if depth_range is not None:
        near, far = depth_range[0], depth_range[1]
    w2c, K = pose_ref['w2cs'][0], pose_ref['intrinsics'][0]
    N_ray, N_sample = point_samples.shape[0], point_samples.shape[1]

    pts = point_samples.reshape(-1, 3)
    cam = pts @ w2c[:3, :3].T + w2c[:3, 3]
    pix = cam @ K.T
    x = pix[:, 0] / pix[:, 2] / (W - 1)
    y = pix[:, 1] / pix[:, 2] / (H - 1)
    z = (pix[:, 2] - near) / (far - near)
    gx, gy, gz = x * (Wv - 1), y * (Hv - 1), z * (D - 1)

    x0, y0, z0 = jnp.floor(gx), jnp.floor(gy), jnp.floor(gz)
    wx1, wy1, wz1 = gx - x0, gy - y0, gz - z0
    vol = feat_volume[0]

    def tap(zi, yi, xi):
        valid = ((zi >= 0) & (zi <= D - 1) & (yi >= 0) & (yi <= Hv - 1)
                 & (xi >= 0) & (xi <= Wv - 1))
        zc = jnp.clip(zi, 0, D - 1).astype(jnp.int32)
        yc = jnp.clip(yi, 0, Hv - 1).astype(jnp.int32)
        xc = jnp.clip(xi, 0, Wv - 1).astype(jnp.int32)
        v = vol[:, zc, yc, xc]
        return jnp.where(valid[None, :], v, 0.0)

    out = jnp.zeros((C, pts.shape[0]), jnp.float32)
    for dz, wz in ((z0, 1 - wz1), (z0 + 1, wz1)):
        for dy, wy in ((y0, 1 - wy1), (y0 + 1, wy1)):
            for dx, wx in ((x0, 1 - wx1), (x0 + 1, wx1)):
                out = out + tap(dz, dy, dx) * (wz * wy * wx)[None, :]
    return out.T.reshape(N_ray, N_sample, C)


if __name__ == "__main__":
    key = jax.random.PRNGKey(0)
    k1, k2, k3 = jax.random.split(key, 3)

    C, D, Hv, Wv = 8, 8, 16, 16
    N_ray, N_sample = 1024, 8         # 8192 points -> 8 parallel grid steps at tile_n=1024
    H_img, W_img = 64, 64

    # Deterministic "parameter" (the nn.Parameter volume) and inputs.
    feat_volume = jax.random.normal(k1, (1, C, D, Hv, Wv), jnp.float32)

    th = 0.087
    c, s = float(jnp.cos(th)), float(jnp.sin(th))
    w2c = jnp.array([[c, -s, 0.0, 0.1],
                     [s,  c, 0.0, -0.2],
                     [0.0, 0.0, 1.0, 0.5],
                     [0.0, 0.0, 0.0, 1.0]], jnp.float32)
    K = jnp.array([[40.0, 0.0, 31.5],
                   [0.0, 40.0, 31.5],
                   [0.0, 0.0, 1.0]], jnp.float32)
    pose_ref = {
        'near_fars': jnp.array([2.0, 6.0], jnp.float32),
        'w2cs': w2c[None],
        'intrinsics': K[None],
    }

    xy = jax.random.uniform(k2, (N_ray, N_sample, 2), jnp.float32, -2.0, 2.0)
    zz = jax.random.uniform(k3, (N_ray, N_sample, 1), jnp.float32, 1.8, 5.2)
    point_samples = jnp.concatenate([xy, zz], axis=-1)

    shape = (1, 3, H_img, W_img)   # only [-2], [-1] are used (image H, W)

    # One-time volume layout (would live at parameter-init time in a model).
    volT = precompute_ref_volume(feat_volume, jnp.bfloat16)

    feats = ref_volume_forward(feat_volume, shape, point_samples, pose_ref,
                               volT=volT)
    feats = jax.block_until_ready(feats)

    ref = ref_volume_forward_jax(feat_volume, shape, point_samples, pose_ref)
    assert feats.shape == (N_ray, N_sample, C), feats.shape
    max_err = float(jnp.max(jnp.abs(feats - ref)))
    # bf16 MXU operands (weights + volume) with exact reciprocal and f32
    # accumulation -> expected ~1e-2 max abs error on O(1) features.
    assert max_err < 5e-2, max_err

    print("KERNEL_OK")
</pallas_src>

<mosaic_0001>
module attributes {stable_mosaic.version = 11 : i64} {
  func.func @_ref_volume_kernel(%arg0: i32, %arg1: memref<18xf32, #tpu.memory_space<smem>>, %arg2: memref<3x1024xf32, #tpu.memory_space<vmem>>, %arg3: memref<128x128xbf16, #tpu.memory_space<vmem>>, %arg4: memref<8x1xf32, #tpu.memory_space<vmem>>, %arg5: memref<16x1xf32, #tpu.memory_space<vmem>>, %arg6: memref<16x1xf32, #tpu.memory_space<vmem>>, %arg7: memref<8x1024xf32, #tpu.memory_space<vmem>>) attributes {dimension_semantics = [#tpu.dimension_semantics<parallel>], iteration_bounds = array<i64: 8>, scalar_prefetch = 0 : i64, scratch_operands = 0 : i64, tpu.core_type = #tpu.core_type<tc>, window_params = [{transform_indices = @transform_0, window_bounds = array<i64: 18>}, {transform_indices = @transform_1, window_bounds = array<i64: 3, 1024>}, {pipeline_mode = #tpu.pipeline_mode<synchronous>, transform_indices = @transform_2, window_bounds = array<i64: 128, 128>}, {pipeline_mode = #tpu.pipeline_mode<synchronous>, transform_indices = @transform_3, window_bounds = array<i64: 8, 1>}, {pipeline_mode = #tpu.pipeline_mode<synchronous>, transform_indices = @transform_4, window_bounds = array<i64: 16, 1>}, {pipeline_mode = #tpu.pipeline_mode<synchronous>, transform_indices = @transform_5, window_bounds = array<i64: 16, 1>}, {transform_indices = @transform_6, window_bounds = array<i64: 8, 1024>}]} {
    %c0 = arith.constant 0 : index
    %c0_0 = arith.constant 0 : index
    %0 = vector.load %arg2[%c0, %c0_0] : memref<3x1024xf32, #tpu.memory_space<vmem>>, vector<3x1024xf32>
    %1 = vector.extract_strided_slice %0 {offsets = [0, 0], sizes = [1, 1024], strides = [1, 1]} : vector<3x1024xf32> to vector<1x1024xf32>
    %2 = vector.extract_strided_slice %0 {offsets = [1, 0], sizes = [1, 1024], strides = [1, 1]} : vector<3x1024xf32> to vector<1x1024xf32>
    %3 = vector.extract_strided_slice %0 {offsets = [2, 0], sizes = [1, 1024], strides = [1, 1]} : vector<3x1024xf32> to vector<1x1024xf32>
    %c0_1 = arith.constant 0 : index
    %4 = memref.load %arg1[%c0_1] : memref<18xf32, #tpu.memory_space<smem>>
    %5 = vector.broadcast %4 : f32 to vector<1x1024xf32>
    %6 = arith.mulf %5, %1 : vector<1x1024xf32>
    %c1 = arith.constant 1 : index
    %7 = memref.load %arg1[%c1] : memref<18xf32, #tpu.memory_space<smem>>
    %8 = vector.broadcast %7 : f32 to vector<1x1024xf32>
    %9 = arith.mulf %8, %2 : vector<1x1024xf32>
    %10 = arith.addf %6, %9 : vector<1x1024xf32>
    %c2 = arith.constant 2 : index
    %11 = memref.load %arg1[%c2] : memref<18xf32, #tpu.memory_space<smem>>
    %12 = vector.broadcast %11 : f32 to vector<1x1024xf32>
    %13 = arith.mulf %12, %3 : vector<1x1024xf32>
    %14 = arith.addf %10, %13 : vector<1x1024xf32>
    %c3 = arith.constant 3 : index
    %15 = memref.load %arg1[%c3] : memref<18xf32, #tpu.memory_space<smem>>
    %16 = vector.broadcast %15 : f32 to vector<1x1024xf32>
    %17 = arith.addf %14, %16 : vector<1x1024xf32>
    %c4 = arith.constant 4 : index
    %18 = memref.load %arg1[%c4] : memref<18xf32, #tpu.memory_space<smem>>
    %19 = vector.broadcast %18 : f32 to vector<1x1024xf32>
    %20 = arith.mulf %19, %1 : vector<1x1024xf32>
    %c5 = arith.constant 5 : index
    %21 = memref.load %arg1[%c5] : memref<18xf32, #tpu.memory_space<smem>>
    %22 = vector.broadcast %21 : f32 to vector<1x1024xf32>
    %23 = arith.mulf %22, %2 : vector<1x1024xf32>
    %24 = arith.addf %20, %23 : vector<1x1024xf32>
    %c6 = arith.constant 6 : index
    %25 = memref.load %arg1[%c6] : memref<18xf32, #tpu.memory_space<smem>>
    %26 = vector.broadcast %25 : f32 to vector<1x1024xf32>
    %27 = arith.mulf %26, %3 : vector<1x1024xf32>
    %28 = arith.addf %24, %27 : vector<1x1024xf32>
    %c7 = arith.constant 7 : index
    %29 = memref.load %arg1[%c7] : memref<18xf32, #tpu.memory_space<smem>>
    %30 = vector.broadcast %29 : f32 to vector<1x1024xf32>
    %31 = arith.addf %28, %30 : vector<1x1024xf32>
    %c8 = arith.constant 8 : index
    %32 = memref.load %arg1[%c8] : memref<18xf32, #tpu.memory_space<smem>>
    %33 = vector.broadcast %32 : f32 to vector<1x1024xf32>
    %34 = arith.mulf %33, %1 : vector<1x1024xf32>
    %c9 = arith.constant 9 : index
    %35 = memref.load %arg1[%c9] : memref<18xf32, #tpu.memory_space<smem>>
    %36 = vector.broadcast %35 : f32 to vector<1x1024xf32>
    %37 = arith.mulf %36, %2 : vector<1x1024xf32>
    %38 = arith.addf %34, %37 : vector<1x1024xf32>
    %c10 = arith.constant 10 : index
    %39 = memref.load %arg1[%c10] : memref<18xf32, #tpu.memory_space<smem>>
    %40 = vector.broadcast %39 : f32 to vector<1x1024xf32>
    %41 = arith.mulf %40, %3 : vector<1x1024xf32>
    %42 = arith.addf %38, %41 : vector<1x1024xf32>
    %c11 = arith.constant 11 : index
    %43 = memref.load %arg1[%c11] : memref<18xf32, #tpu.memory_space<smem>>
    %44 = vector.broadcast %43 : f32 to vector<1x1024xf32>
    %45 = arith.addf %42, %44 : vector<1x1024xf32>
    %cst = arith.constant 0.000000e+00 : f32
    %46 = vector.broadcast %cst : f32 to vector<1x1024xf32>
    %47 = arith.cmpf oge, %45, %46 : vector<1x1024xf32>
    %cst_2 = arith.constant 9.99999993E-9 : f32
    %48 = vector.broadcast %cst_2 : f32 to vector<1x1024xf32>
    %49 = arith.maximumf %45, %48 : vector<1x1024xf32>
    %cst_3 = arith.constant -9.99999993E-9 : f32
    %50 = vector.broadcast %cst_3 : f32 to vector<1x1024xf32>
    %51 = arith.minimumf %45, %50 : vector<1x1024xf32>
    %52 = arith.select %47, %49, %51 : vector<1x1024xi1>, vector<1x1024xf32>
    %53 = tpu.reciprocal %52 : vector<1x1024xf32> -> vector<1x1024xf32>
    %54 = arith.mulf %17, %53 : vector<1x1024xf32>
    %c12 = arith.constant 12 : index
    %55 = memref.load %arg1[%c12] : memref<18xf32, #tpu.memory_space<smem>>
    %56 = vector.broadcast %55 : f32 to vector<1x1024xf32>
    %57 = arith.mulf %54, %56 : vector<1x1024xf32>
    %c13 = arith.constant 13 : index
    %58 = memref.load %arg1[%c13] : memref<18xf32, #tpu.memory_space<smem>>
    %59 = vector.broadcast %58 : f32 to vector<1x1024xf32>
    %60 = arith.addf %57, %59 : vector<1x1024xf32>
    %61 = arith.mulf %31, %53 : vector<1x1024xf32>
    %c14 = arith.constant 14 : index
    %62 = memref.load %arg1[%c14] : memref<18xf32, #tpu.memory_space<smem>>
    %63 = vector.broadcast %62 : f32 to vector<1x1024xf32>
    %64 = arith.mulf %61, %63 : vector<1x1024xf32>
    %c15 = arith.constant 15 : index
    %65 = memref.load %arg1[%c15] : memref<18xf32, #tpu.memory_space<smem>>
    %66 = vector.broadcast %65 : f32 to vector<1x1024xf32>
    %67 = arith.addf %64, %66 : vector<1x1024xf32>
    %c16 = arith.constant 16 : index
    %68 = memref.load %arg1[%c16] : memref<18xf32, #tpu.memory_space<smem>>
    %69 = vector.broadcast %68 : f32 to vector<1x1024xf32>
    %70 = arith.mulf %45, %69 : vector<1x1024xf32>
    %c17 = arith.constant 17 : index
    %71 = memref.load %arg1[%c17] : memref<18xf32, #tpu.memory_space<smem>>
    %72 = vector.broadcast %71 : f32 to vector<1x1024xf32>
    %73 = arith.addf %70, %72 : vector<1x1024xf32>
    %c0_4 = arith.constant 0 : index
    %c0_5 = arith.constant 0 : index
    %74 = vector.load %arg4[%c0_4, %c0_5] : memref<8x1xf32, #tpu.memory_space<vmem>>, vector<8x1xf32>
    %75 = vector.broadcast %73 : vector<1x1024xf32> to vector<8x1024xf32>
    %76 = vector.broadcast %74 : vector<8x1xf32> to vector<8x1024xf32>
    %77 = arith.subf %75, %76 : vector<8x1024xf32>
    %78 = math.absf %77 : vector<8x1024xf32>
    %cst_6 = arith.constant 1.000000e+00 : f32
    %79 = vector.broadcast %cst_6 : f32 to vector<8x1024xf32>
    %80 = arith.subf %79, %78 : vector<8x1024xf32>
    %cst_7 = arith.constant 0.000000e+00 : f32
    %81 = vector.broadcast %cst_7 : f32 to vector<8x1024xf32>
    %82 = arith.maximumf %81, %80 : vector<8x1024xf32>
    %c0_8 = arith.constant 0 : index
    %c0_9 = arith.constant 0 : index
    %83 = vector.load %arg5[%c0_8, %c0_9] : memref<16x1xf32, #tpu.memory_space<vmem>>, vector<16x1xf32>
    %84 = vector.broadcast %67 : vector<1x1024xf32> to vector<16x1024xf32>
    %85 = vector.broadcast %83 : vector<16x1xf32> to vector<16x1024xf32>
    %86 = arith.subf %84, %85 : vector<16x1024xf32>
    %87 = math.absf %86 : vector<16x1024xf32>
    %cst_10 = arith.constant 1.000000e+00 : f32
    %88 = vector.broadcast %cst_10 : f32 to vector<16x1024xf32>
    %89 = arith.subf %88, %87 : vector<16x1024xf32>
    %cst_11 = arith.constant 0.000000e+00 : f32
    %90 = vector.broadcast %cst_11 : f32 to vector<16x1024xf32>
    %91 = arith.maximumf %90, %89 : vector<16x1024xf32>
    %c0_12 = arith.constant 0 : index
    %c0_13 = arith.constant 0 : index
    %92 = vector.load %arg6[%c0_12, %c0_13] : memref<16x1xf32, #tpu.memory_space<vmem>>, vector<16x1xf32>
    %93 = vector.broadcast %60 : vector<1x1024xf32> to vector<16x1024xf32>
    %94 = vector.broadcast %92 : vector<16x1xf32> to vector<16x1024xf32>
    %95 = arith.subf %93, %94 : vector<16x1024xf32>
    %96 = math.absf %95 : vector<16x1024xf32>
    %cst_14 = arith.constant 1.000000e+00 : f32
    %97 = vector.broadcast %cst_14 : f32 to vector<16x1024xf32>
    %98 = arith.subf %97, %96 : vector<16x1024xf32>
    %cst_15 = arith.constant 0.000000e+00 : f32
    %99 = vector.broadcast %cst_15 : f32 to vector<16x1024xf32>
    %100 = arith.maximumf %99, %98 : vector<16x1024xf32>
    %101 = vector.shape_cast %82 : vector<8x1024xf32> to vector<8x1x1024xf32>
    %102 = vector.shape_cast %91 : vector<16x1024xf32> to vector<1x16x1024xf32>
    %103 = vector.broadcast %101 : vector<8x1x1024xf32> to vector<8x16x1024xf32>
    %104 = vector.broadcast %102 : vector<1x16x1024xf32> to vector<8x16x1024xf32>
    %105 = arith.mulf %103, %104 : vector<8x16x1024xf32>
    %106 = vector.shape_cast %105 : vector<8x16x1024xf32> to vector<128x1024xf32>
    %c0_16 = arith.constant 0 : index
    %c0_17 = arith.constant 0 : index
    %107 = vector.load %arg3[%c0_16, %c0_17] : memref<128x128xbf16, #tpu.memory_space<vmem>>, vector<128x128xbf16>
    %108 = arith.truncf %106 : vector<128x1024xf32> to vector<128x1024xbf16>
    %cst_18 = arith.constant dense<0.000000e+00> : vector<128x1024xf32>
    %109 = tpu.matmul %107, %108, %cst_18 {dimension_numbers = #tpu.dot_dimension_numbers<[1], [0], [0], [1], [0, 0, 1, 1], [], []>} : vector<128x128xbf16>, vector<128x1024xbf16>, vector<128x1024xf32> -> vector<128x1024xf32>
    %110 = vector.shape_cast %100 : vector<16x1024xf32> to vector<16x1x1024xf32>
    %111 = vector.shape_cast %110 : vector<16x1x1024xf32> to vector<16x1x1024xf32>
    %112 = vector.broadcast %111 : vector<16x1x1024xf32> to vector<16x8x1024xf32>
    %113 = vector.shape_cast %112 : vector<16x8x1024xf32> to vector<128x1024xf32>
    %114 = arith.mulf %109, %113 : vector<128x1024xf32>
    %115 = vector.extract_strided_slice %114 {offsets = [0, 0], sizes = [8, 1024], strides = [1, 1]} : vector<128x1024xf32> to vector<8x1024xf32>
    %116 = vector.extract_strided_slice %114 {offsets = [8, 0], sizes = [8, 1024], strides = [1, 1]} : vector<128x1024xf32> to vector<8x1024xf32>
    %117 = arith.addf %115, %116 : vector<8x1024xf32>
    %118 = vector.extract_strided_slice %114 {offsets = [16, 0], sizes = [8, 1024], strides = [1, 1]} : vector<128x1024xf32> to vector<8x1024xf32>
    %119 = arith.addf %117, %118 : vector<8x1024xf32>
    %120 = vector.extract_strided_slice %114 {offsets = [24, 0], sizes = [8, 1024], strides = [1, 1]} : vector<128x1024xf32> to vector<8x1024xf32>
    %121 = arith.addf %119, %120 : vector<8x1024xf32>
    %122 = vector.extract_strided_slice %114 {offsets = [32, 0], sizes = [8, 1024], strides = [1, 1]} : vector<128x1024xf32> to vector<8x1024xf32>
    %123 = arith.addf %121, %122 : vector<8x1024xf32>
    %124 = vector.extract_strided_slice %114 {offsets = [40, 0], sizes = [8, 1024], strides = [1, 1]} : vector<128x1024xf32> to vector<8x1024xf32>
    %125 = arith.addf %123, %124 : vector<8x1024xf32>
    %126 = vector.extract_strided_slice %114 {offsets = [48, 0], sizes = [8, 1024], strides = [1, 1]} : vector<128x1024xf32> to vector<8x1024xf32>
    %127 = arith.addf %125, %126 : vector<8x1024xf32>
    %128 = vector.extract_strided_slice %114 {offsets = [56, 0], sizes = [8, 1024], strides = [1, 1]} : vector<128x1024xf32> to vector<8x1024xf32>
    %129 = arith.addf %127, %128 : vector<8x1024xf32>
    %130 = vector.extract_strided_slice %114 {offsets = [64, 0], sizes = [8, 1024], strides = [1, 1]} : vector<128x1024xf32> to vector<8x1024xf32>
    %131 = arith.addf %129, %130 : vector<8x1024xf32>
    %132 = vector.extract_strided_slice %114 {offsets = [72, 0], sizes = [8, 1024], strides = [1, 1]} : vector<128x1024xf32> to vector<8x1024xf32>
    %133 = arith.addf %131, %132 : vector<8x1024xf32>
    %134 = vector.extract_strided_slice %114 {offsets = [80, 0], sizes = [8, 1024], strides = [1, 1]} : vector<128x1024xf32> to vector<8x1024xf32>
    %135 = arith.addf %133, %134 : vector<8x1024xf32>
    %136 = vector.extract_strided_slice %114 {offsets = [88, 0], sizes = [8, 1024], strides = [1, 1]} : vector<128x1024xf32> to vector<8x1024xf32>
    %137 = arith.addf %135, %136 : vector<8x1024xf32>
    %138 = vector.extract_strided_slice %114 {offsets = [96, 0], sizes = [8, 1024], strides = [1, 1]} : vector<128x1024xf32> to vector<8x1024xf32>
    %139 = arith.addf %137, %138 : vector<8x1024xf32>
    %140 = vector.extract_strided_slice %114 {offsets = [104, 0], sizes = [8, 1024], strides = [1, 1]} : vector<128x1024xf32> to vector<8x1024xf32>
    %141 = arith.addf %139, %140 : vector<8x1024xf32>
    %142 = vector.extract_strided_slice %114 {offsets = [112, 0], sizes = [8, 1024], strides = [1, 1]} : vector<128x1024xf32> to vector<8x1024xf32>
    %143 = arith.addf %141, %142 : vector<8x1024xf32>
    %144 = vector.extract_strided_slice %114 {offsets = [120, 0], sizes = [8, 1024], strides = [1, 1]} : vector<128x1024xf32> to vector<8x1024xf32>
    %145 = arith.addf %143, %144 : vector<8x1024xf32>
    %c0_19 = arith.constant 0 : index
    %c0_20 = arith.constant 0 : index
    %146 = vector.load %arg7[%c0_19, %c0_20] : memref<8x1024xf32, #tpu.memory_space<vmem>>, vector<8x1024xf32>
    tpu.vector_store %arg7[%c0_19, %c0_20], %145 {strides = array<i32>} : memref<8x1024xf32, #tpu.memory_space<vmem>>, vector<8x1024xf32>,
    return
  }
  func.func @transform_0(%arg0: i32) -> i32 {
    %c0_i32 = arith.constant 0 : i32
    %c0_i32_0 = arith.constant 0 : i32
    return %c0_i32 : i32
  }
  func.func @transform_1(%arg0: i32) -> (i32, i32) {
    %c0_i32 = arith.constant 0 : i32
    %c0_i32_0 = arith.constant 0 : i32
    return %c0_i32, %arg0 : i32, i32
  }
  func.func @transform_2(%arg0: i32) -> (i32, i32) {
    %c0_i32 = arith.constant 0 : i32
    %c0_i32_0 = arith.constant 0 : i32
    %c0_i32_1 = arith.constant 0 : i32
    return %c0_i32, %c0_i32_0 : i32, i32
  }
  func.func @transform_3(%arg0: i32) -> (i32, i32) {
    %c0_i32 = arith.constant 0 : i32
    %c0_i32_0 = arith.constant 0 : i32
    %c0_i32_1 = arith.constant 0 : i32
    return %c0_i32, %c0_i32_0 : i32, i32
  }
  func.func @transform_4(%arg0: i32) -> (i32, i32) {
    %c0_i32 = arith.constant 0 : i32
    %c0_i32_0 = arith.constant 0 : i32
    %c0_i32_1 = arith.constant 0 : i32
    return %c0_i32, %c0_i32_0 : i32, i32
  }
  func.func @transform_5(%arg0: i32) -> (i32, i32) {
    %c0_i32 = arith.constant 0 : i32
    %c0_i32_0 = arith.constant 0 : i32
    %c0_i32_1 = arith.constant 0 : i32
    return %c0_i32, %c0_i32_0 : i32, i32
  }
  func.func @transform_6(%arg0: i32) -> (i32, i32) {
    %c0_i32 = arith.constant 0 : i32
    %c0_i32_0 = arith.constant 0 : i32
    return %c0_i32, %arg0 : i32, i32
  }
}

</mosaic_0001>

<bundles_post_ra>
// kernel: tpu_custom_call.1
= control target key start
LH: loop header
LB: loop body
LE: loop exit
PB: predicated region body
PF: predicated region fallthrough
CT: control target
= control target key end

     0   :  { %11 = vsyncpa [#allocation5], 0  ;;  %s5014_s0 = inlined_call_operand.vmem [shape: f32[18], index: 0, kind: input, shape index: {}]   ;;  %s5015_s1 = inlined_call_operand.hbm [shape: f32[3,8192], index: 1, kind: input, shape index: {}]   ;;  %s5016_s2 = inlined_call_operand.hbm [shape: bf16[128,128], index: 2, kind: input, shape index: {}]   ;;  %s5017_s3 = inlined_call_operand.vmem [shape: f32[8,1], index: 3, kind: input, shape index: {}]   ;;  %s5018_s4 = inlined_call_operand.vmem [shape: f32[16,1], index: 4, kind: input, shape index: {}]   ;;  %s5019_s5 = inlined_call_operand.vmem [shape: f32[16,1], index: 5, kind: input, shape index: {}]   ;;  %s5020_s6 = inlined_call_operand.hbm [shape: f32[8,8192], index: 6, kind: output, shape index: {}]  }
   0x1   :  { %12 = vsyncpa [#allocation3], 0 }
   0x2   :  { %14 = vsyncpa [#allocation3 + $0x1], 0 }
   0x3   :  { %15 = vsyncpa [#allocation8], 0 }
   0x4   :  { %16 = vsyncpa [#allocation4], 0 }
   0x5   :  { %18 = vsyncpa [#allocation4 + $0x1], 0  ;;  %s3791_s21 = smov 0   ;;  %s3793_s22 = smov 0  }
   0x6   :  { %s3795_s23 = smov 0   ;;  %s3797_s24 = smov 0  }
   0x7 LB: > { %s3812_s25 = sadd.s32 4294967295, %s3746_s24   ;;  %s3441_s26 = sadd.s32 4294967294, %s3746_s24   ;;  %s3746_s24 = sphi %s3797_s24, %s5069_s24   ;;  %s3742_s23 = sphi %s3795_s23, %s5068_s23   ;;  %s3738_s22 = sphi %s3793_s22, %s5067_s22   ;;  %s3734_s21 = sphi %s3791_s21, %s5066_s21  }
   0x8   : > { %p65_p0 = scmp.ne.s32.totalorder %s3738_s22, %s3734_s21  ;;  %p5021_p1 = scmp.eq.s32.totalorder %s3812_s25, 0 }
   0x9   : > { %p179_p3 = scmp.eq.s32.totalorder %s3441_s26, 7  ;;  %p3442_p5 = scmp.ge.s32.totalorder %s3746_s24, 1 }
   0xa   : > { %p3821_p4 = por %p5021_p1, %p65_p0  ;;  %p186_p7 = scmp.lt.s32.totalorder %s3746_s24, 9 }
   0xb   : > { %p3826_p6 = por %p179_p3, %p65_p0  ;;  %s199_s7 = sshll.u32 %s5014_s0, 4  ;;  %s200_s7 = int_to_ptr.vmem [resolvable:$true] %s199_s7 }
   0xc   : > { %s5034_s27 = scalar_select %p3821_p4, 1, 0 }
   0xd   : > { %s5035_s28 = scalar_select %p3826_p6, 1, 0 }
   0xe   : > { %p3834_p8 = pnand %p3442_p5, %p186_p7  ;;  %s3748_s9 = smov [#allocation7]  }
   0xf   : > { %s209_s10 = sshll.u32 %s3748_s9, 4  ;;  %s3599_s12 = scalar_lea.vmem %s200_s7, 16  ;;  %s3846_s10 = int_to_ptr.vmem [resolvable:$true] %s209_s10 }
  0x10   : > { %p3522_p9 = pneg %p3834_p8  ;;  %p3600_p11 = scmp.ne.s32.totalorder %s200_s7, %s3599_s12 }
  0x11   : > { %p3607_p3 = scmp.lt.s32.totalorder %s200_s7, %s200_s7  ;;  %p3608_p5 = scmp.lt.s32.totalorder %s3599_s12, %s3599_s12 }
  0x12   : > { %p3842_p10 = pnand %p3522_p9, %p5021_p1 }
  0x13   : > { %p3609_p7 = por %p3608_p5, %p3607_p3 }
  0x14   : > { %p3601_p12 = pneg %p3842_p10 }
  0x16   : > { %p3602_p13 = pnand %p3601_p12, %p3600_p11 }
  0x18   : > { %p3603_p0 = pneg %p3602_p13 }
  0x1a   : > { %p3610_p2 = pnand %p3609_p7, %p3603_p0 }
  0x1c   : > { %3613 = shalt.err (!%p3610_p2)
}
  0x1d   : > { %s3749_s13 = smov [#allocation2]   ;;  %s3614_s16 = scalar_lea.hbm %s5016_s2, 1024 }
  0x1e   : > { %3525 = dma.vmem_to_smem (!%p3842_p10), %s200_s7, 16, %s3749_s13, [#allocation5]  }
  0x1f   : > { %p3615_p9 = scmp.ne.s32.totalorder %s5016_s2, %s3614_s16  ;;  %p3621_p2 = scmp.lt.u32.totalorder %s3614_s16, %s5016_s2 }
  0x21   : > { %p3617_p11 = pnand %p3615_p9, %p3601_p12 }
  0x23   : > { %p3618_p13 = pneg %p3617_p11 }
  0x25   : > { %p3623_p0 = pnand %p3621_p2, %p3618_p13 }
  0x27   : > { %3626 = shalt.err (!%p3623_p0)
}
  0x28   : > { %s3627_s26 = scalar_lea.vmem %s3846_s10, 1024  ;;  %p3635_p1 = scmp.lt.s32.totalorder %s3846_s10, %s3846_s10 }
  0x29   : > { %p3628_p3 = scmp.ne.s32.totalorder %s3846_s10, %s3627_s26  ;;  %p3636_p9 = scmp.lt.s32.totalorder %s3627_s26, %s3627_s26 }
  0x2b   : > { %p3630_p5 = pnand %p3628_p3, %p3601_p12  ;;  %p3637_p11 = por %p3636_p9, %p3635_p1 }
  0x2d   : > { %p3631_p7 = pneg %p3630_p5 }
  0x2f   : > { %p3638_p6 = pnand %p3637_p11, %p3631_p7 }
  0x31   : > { %3641 = shalt.err (!%p3638_p6)
}
  0x32   : > { %s3750_s29 = smov 64   ;;  %s3751_s30 = smov 4  }
  0x33   : > { %3528 = dma.hbm_to_vmem [thread:$0]  (!%p3842_p10), %s5016_s2, 1024, %s3846_s10, [#allocation8], %s3750_s29, %s3750_s29, %s3751_s30  }
  0x34   : > { %s3881_s12 = sadd.s32 1, %s3746_s24   ;;  %s52_s13 = sadd.s32 1, %s3742_s23 }
  0x35   : > { %s49_s14 = ssub.s32 %s3746_s24, %s3881_s12  ;;  %p59_p1 = scmp.ne.s32.totalorder %s3742_s23, %s3738_s22 }
  0x36   : > { %p50_p6 = scmp.eq.s32.totalorder %s49_s14, 0  ;;  %p60_p12 = scmp.eq.s32.totalorder %s3746_s24, 0 }
  0x37   : > { %p5038_p13 = scmp.eq.s32.totalorder %s3812_s25, 7  ;;  %p3539_p0 = scmp.lt.s32.totalorder %s3746_s24, 8 }
  0x38   : > { %s3897_s16 = scalar_select %p50_p6, %s3742_s23, %s52_s13  }
  0x39   : > { %p3891_p2 = por %p5038_p13, %p59_p1  ;;  %p61_p3 = por %p60_p12, %p59_p1 }
  0x3a   : > { %s232_s11 = sand.u32 1, %s3742_s23   ;;  %s3508_s10 = sshll.u32 %s3746_s24, 9 }
  0x3b   : > { %s5039_s15 = scalar_select %p3891_p2, 1, 0 }
  0x3c   : > { %s3446_s17 = sshll.u32 %s232_s11, 5  ;;  %s3904_s20 = scalar_lea.hbm %s5015_s1, %s3508_s10 }
  0x3d   : > { %s236_s26 = scalar_lea.vmem [#allocation6], %s3446_s17  ;;  %p3908_p10 = pnand %p3539_p0, %p61_p3 }
  0x3e   : > { %s244_s29 = sshll.u32 %s236_s26, 4  ;;  %s233_s7 = scalar_lea.sflag [#allocation3], %s232_s11  ;;  %s3906_s29 = int_to_ptr.vmem [resolvable:$true] %s244_s29 }
  0x3f   : > { %s3642_s9 = scalar_lea.hbm %s3904_s20, 512  ;;  %p3644_p7 = pneg %p3908_p10 }
  0x40   : > { %p3643_p5 = scmp.ne.s32.totalorder %s3904_s20, %s3642_s9  ;;  %s3647_s17 = scalar_lea.hbm %s5015_s1, 4096 }
  0x41   : > { %p3648_p1 = scmp.lt.u32.totalorder %s3904_s20, %s5015_s1  ;;  %p3649_p6 = scmp.lt.u32.totalorder %s3647_s17, %s3642_s9 }
  0x42   : > { %p3645_p9 = pnand %p3644_p7, %p3643_p5  ;;  %p3651_p13 = scmp.lt.u32.totalorder %s3642_s9, %s3904_s20 }
  0x43   : > { %p3650_p12 = por %p3649_p6, %p3648_p1 }
  0x44   : > { %p3646_p11 = pneg %p3645_p9 }
  0x45   : > { %p3652_p0 = por %p3651_p13, %p3650_p12 }
  0x47   : > { %p3653_p3 = pnand %p3652_p0, %p3646_p11 }
  0x49   : > { %3656 = shalt.err (!%p3653_p3)
}
  0x4a   : > { %s3657_s11 = scalar_lea.vmem %s3906_s29, 512  ;;  %s3752_s19 = smov [#allocation6]  }
  0x4b   : > { %p3658_p5 = scmp.ne.s32.totalorder %s3906_s29, %s3657_s11  ;;  %s3662_s26 = sshll.u32 %s3752_s19, 4  ;;  %s3663_s26 = int_to_ptr.vmem [resolvable:$false] %s3662_s26 }
  0x4c   : > { %s3664_s13 = scalar_lea.vmem %s3663_s26, 1024  ;;  %p3665_p4 = scmp.lt.s32.totalorder %s3906_s29, %s3663_s26 }
  0x4d   : > { %p3660_p9 = pnand %p3658_p5, %p3644_p7  ;;  %p3666_p1 = scmp.lt.s32.totalorder %s3664_s13, %s3657_s11 }
  0x4f   : > { %p3661_p2 = pneg %p3660_p9  ;;  %p3667_p6 = por %p3666_p1, %p3665_p4 }
  0x51   : > { %p3668_p12 = pnand %p3667_p6, %p3661_p2 }
  0x53   : > { %3671 = shalt.err (!%p3668_p12)
}
  0x54   : > { %3532 = dma.hbm_to_vmem [thread:$0]  (!%p3908_p10), %s3904_s20, 512, %s3906_s29, %s233_s7  }
  0x55   : > { %253 = sbr.rel (%p3834_p8) target bundleno = 701 (0x2bd), region = 44 }
  0x5c   : > { %p5041_p7 = scmp.eq.s32.totalorder %s3812_s25, 0 }
  0x5e   : > { %3717 = dma.done.wait (%p5041_p7), [#allocation5], 16   ;;  %p5042_p11 = pmov %p5041_p7 }
  0x5f   : > { %s3944_s9 = sand.u32 1, %s3738_s22   ;;  %p5043_p4 = scmp.ne.s32.totalorder %s5034_s27, 0 }
  0x60   : > { %3719 = vsyncadd (%p5042_p11), [#allocation5], 4294967280  ;;  %s3451_s14 = sshll.u32 %s3944_s9, 5  ;;  %s260_s30 = scalar_lea.sflag [#allocation3], %s3944_s9 }
  0x61   : > { %s263_s17 = scalar_lea.vmem [#allocation6], %s3451_s14 }
  0x62   : > { %3721 = dma.done.wait (%p5043_p4), %s260_s30, 512  }
  0x63   : > { %3723 = vsyncadd (%p5043_p4), %s260_s30, 4294966784  ;;  %p5044_p8 = pmov %p5041_p7 }
  0x64   : > { %p5045_p2 = pmov %p5041_p7 }
  0x65   : > { %3725 = dma.done.wait (%p5044_p8), [#allocation8], 1024  }
  0x66   : > { %3727 = vsyncadd (%p5045_p2), [#allocation8], 4294966272 }
  0x67   : > { %272 = sfence }
  0x68   : > { %v560_v0 = vld [vmem:[%s5017_s3] sm:$0xff]  ;;  %v675_v1 = vld [vmem:[%s5018_s4 + $0x8] sm:$0xff]  ;;  %v5024_v2 = vmov 0   ;;  %s3478_s19 = sld [smem:[#allocation2 + $0x9]]  ;;  %s3477_s14 = sld [smem:[#allocation2 + $0x8]] }
  0x69   : > { %3581 = vset.pattern.permute.xlu0 %v5024_v2  ;;  %3582 = vset.pattern.permute.xlu1 %v5024_v2  ;;  %v674_v3 = vld [vmem:[%s5018_s4] sm:$0xff]  ;;  %v827_v5 = vld [vmem:[%s5019_s5 + $0x8] sm:$0xff]  ;;  %s3483_s30 = sld [smem:[#allocation2 + $0xa]]  ;;  %v3979_v8 = vld [vmem:[%s263_s17 + $0x10] sm:$0x77]  ;;  %s3454_s8 = sld [smem:[#allocation2 + $0x1]] }
  0x6a   : > { %639 = vperm.xlu0 %3581, %v560_v0   ;;  %759 = vperm.xlu1 %3582, %v675_v1   ;;  %v826_v4 = vld [vmem:[%s5019_s5] sm:$0xff]  ;;  %v3977_v7 = vld [vmem:[%s263_s17 + $0x8] sm:$0x77]  ;;  %v3981_v9 = vld [vmem:[%s263_s17 + $0x18] sm:$0x77]  ;;  %s304_s20 = sld [smem:[#allocation2]] }
  0x6b   : > { %1730 = vmatprep.mubr.bf16.mxu0 %v5024_v2  ;;  %1843 = vmatprep.mubr.bf16.mxu1 %v5024_v2  ;;  %v3975_v6 = vld [vmem:[%s263_s17] sm:$0x77]  ;;  %s3488_s17 = sld [smem:[#allocation2 + $0xb]]  ;;  %s3459_s29 = sld [smem:[#allocation2 + $0x2]] }
  0x6c   : > { %s4016_s7 = sld [smem:[#allocation2 + $0x3]]  ;;  %s3466_s27 = sld [smem:[#allocation2 + $0x5]] }
  0x6d   : > { %s3465_s10 = sld [smem:[#allocation2 + $0x4]]  ;;  %s3471_s18 = sld [smem:[#allocation2 + $0x6]] }
  0x6e   : > { %754 = vperm.xlu0 %3581, %v674_v3   ;;  %906 = vperm.xlu1 %3582, %v826_v4   ;;  %v439_v10 = vstv %s3478_s19  ;;  %v433_v11 = vstv %s3477_s14  ;;  %s3476_s11 = sld [smem:[#allocation2 + $0x7]]  ;;  %s3493_s19 = sld [smem:[#allocation2 + $0x10]] }
  0x6f   : > { %v440_v12 = vmul.f32 %v439_v10, %v3975_v6  ;;  %v441_v13 = vmul.f32 %v439_v10, %v3977_v7  ;;  %v442_v14 = vmul.f32 %v439_v10, %v3979_v8  ;;  %v443_v15 = vmul.f32 %v439_v10, %v3981_v9  ;;  %s3494_s26 = sld [smem:[#allocation2 + $0x11]]  ;;  %s3491_s13 = sld [smem:[#allocation2 + $0xe]] }
  0x70   : > { %v465_v16 = vstv %s3483_s30  ;;  %v434_v17 = vmul.f32 %v433_v11, %v3975_v6  ;;  %v435_v18 = vmul.f32 %v433_v11, %v3977_v7  ;;  %v436_v19 = vmul.f32 %v433_v11, %v3979_v8  ;;  %s3489_s14 = sld [smem:[#allocation2 + $0xc]]  ;;  %s3492_s30 = sld [smem:[#allocation2 + $0xf]] }
  0x71   : > { %v437_v20 = vmul.f32 %v433_v11, %v3981_v9  ;;  %v3479_v21 = vrot.slane %v440_v12, 9  ;;  %v3480_v22 = vrot.slane %v441_v13, 9  ;;  %v466_v23 = vmul.f32 %v465_v16, %v3975_v6  ;;  %p5064_p13 = scmp.ne.s32.totalorder %s5039_s15, 0 }
  0x72   : > { %911 = vperm.xlu0 %3581, %v827_v5   ;;  %v467_v24 = vmul.f32 %v465_v16, %v3977_v7  ;;  %v3481_v25 = vrot.slane %v442_v14, 9  ;;  %v3482_v26 = vrot.slane %v443_v15, 9  ;;  %v468_v27 = vmul.f32 %v465_v16, %v3979_v8 }
  0x73   : > { %v469_v28 = vmul.f32 %v465_v16, %v3981_v9  ;;  %v460_v29 = vadd.f32 %v3479_v21, %v434_v17  ;;  %v461_v30 = vadd.f32 %v3480_v22, %v435_v18  ;;  %v3484_v31 = vrot.slane %v466_v23, 10 }
  0x74   : > { %v3485_v32 = vrot.slane %v467_v24, 10  ;;  %v462_v33 = vadd.f32 %v3481_v25, %v436_v19  ;;  %v463_v34 = vadd.f32 %v3482_v26, %v437_v20  ;;  %v3486_v35 = vrot.slane %v468_v27, 10 }
  0x75   : > { %v3487_v36 = vrot.slane %v469_v28, 10  ;;  %v486_v37 = vadd.f32 %v3484_v31, %v460_v29  ;;  %v491_v41 = vstv %s3488_s17  ;;  %v311_v42 = vstv %s3454_s8  ;;  %s3490_s17 = sld [smem:[#allocation2 + $0xd]]  ;;  %s3453_s8 = sshll.u32 %s3944_s9, 6 }
  0x76   : > { %v487_v38 = vadd.f32 %v3485_v32, %v461_v30  ;;  %v488_v39 = vadd.f32 %v3486_v35, %v462_v33  ;;  %v305_v45 = vstv %s304_s20  ;;  %v312_v48 = vmul.f32 %v311_v42, %v3975_v6  ;;  %s4828_s20 = scalar_lea.vmem [#allocation9], %s3453_s8 }
  0x77   : > { %v489_v40 = vadd.f32 %v3487_v36, %v463_v34  ;;  %v3995_v43 = vadd.f32 %v491_v41, %v486_v37  ;;  %v306_v49 = vmul.f32 %v305_v45, %v3975_v6  ;;  %v307_v50 = vmul.f32 %v305_v45, %v3977_v7 }
  0x78   : > { %v3997_v44 = vadd.f32 %v491_v41, %v487_v38  ;;  %v3999_v46 = vadd.f32 %v491_v41, %v488_v39  ;;  %v337_v51 = vstv %s3459_s29  ;;  %v313_v54 = vmul.f32 %v311_v42, %v3977_v7  ;;  %s3509_s29 = sshll.u32 %s3812_s25, 10  ;;  %s3335_s25 = scalar_lea.sflag [#allocation4], %s3944_s9 }
  0x79   : > { %v4001_v47 = vadd.f32 %v491_v41, %v489_v40  ;;  %v500_v52 = vmax.f32 %v3995_v43, 1e-08  ;;  %v314_v55 = vmul.f32 %v311_v42, %v3979_v8  ;;  %v504_v58 = vmin.f32 %v3995_v43, -1e-08 }
  0x7a   : > { %v501_v53 = vmax.f32 %v3997_v44, 1e-08  ;;  %v502_v56 = vmax.f32 %v3999_v46, 1e-08  ;;  %v308_v59 = vmul.f32 %v305_v45, %v3979_v8  ;;  %v315_v60 = vmul.f32 %v311_v42, %v3981_v9 }
  0x7b   : > { %v503_v57 = vmax.f32 %v4001_v47, 1e-08  ;;  %v3455_v61 = vrot.slane %v312_v48, 9  ;;  %v338_v62 = vmul.f32 %v337_v51, %v3975_v6  ;;  %vm496_vm0 = vcmp.ge.f32.partialorder %v3995_v43, 0.0 }
  0x7c   : > { %v505_v63 = vmin.f32 %v3997_v44, -1e-08  ;;  %v506_v0 = vmin.f32 %v3999_v46, -1e-08  ;;  %v507_v1 = vmin.f32 %v4001_v47, -1e-08  ;;  %v309_v3 = vmul.f32 %v305_v45, %v3981_v9 }
  0x7d   : > { %v3456_v4 = vrot.slane %v313_v54, 9  ;;  %v3457_v5 = vrot.slane %v314_v55, 9  ;;  %v339_v10 = vmul.f32 %v337_v51, %v3977_v7  ;;  %v340_v11 = vmul.f32 %v337_v51, %v3979_v8 }
  0x7e   : > { %vm497_vm1 = vcmp.ge.f32.partialorder %v3997_v44, 0.0  ;;  %vm498_vm2 = vcmp.ge.f32.partialorder %v3999_v46, 0.0  ;;  %vm499_vm3 = vcmp.ge.f32.partialorder %v4001_v47, 0.0  ;;  %v508_v12 = vsel %vm496_vm0, %v500_v52, %v504_v58 }
  0x7f   : > { %v3458_v13 = vrot.slane %v315_v60, 9  ;;  %v332_v14 = vadd.f32 %v3455_v61, %v306_v49  ;;  %v341_v15 = vmul.f32 %v337_v51, %v3981_v9  ;;  %v3460_v16 = vrot.slane %v338_v62, 10 }
  0x80   : > { %v509_v17 = vsel %vm497_vm1, %v501_v53, %v505_v63  ;;  %v510_v18 = vsel %vm498_vm2, %v502_v56, %v506_v0  ;;  %3591 = vrcp.f32 %v508_v12  ;;  %v333_v19 = vadd.f32 %v3456_v4, %v307_v50 }
  0x81   : > { %v3461_v20 = vrot.slane %v339_v10, 10  ;;  %v511_v21 = vsel %vm499_vm3, %v503_v57, %v507_v1  ;;  %v334_v22 = vadd.f32 %v3457_v5, %v308_v59  ;;  %v3462_v23 = vrot.slane %v340_v11, 10 }
  0x82   : > { %3593 = vrcp.f32 %v509_v17  ;;  %v335_v24 = vadd.f32 %v3458_v13, %v309_v3  ;;  %v3463_v25 = vrot.slane %v341_v15, 10  ;;  %v358_v26 = vadd.f32 %v3460_v16, %v332_v14 }
  0x83   : > { %3595 = vrcp.f32 %v510_v18  ;;  %v363_v27 = vstv %s4016_s7  ;;  %v359_v28 = vadd.f32 %v3461_v20, %v333_v19  ;;  %v360_v29 = vadd.f32 %v3462_v23, %v334_v22  ;;  %s3349_s7 = sshll.u32 %s4828_s20, 4  ;;  %s4969_s7 = int_to_ptr.vmem [resolvable:$true] %s3349_s7 }
  0x84   : > { %3597 = vrcp.f32 %v511_v21  ;;  %v361_v30 = vadd.f32 %v3463_v25, %v335_v24  ;;  %v364_v31 = vadd.f32 %v363_v27, %v358_v26  ;;  %v375_v45 = vstv %s3466_s27 }
  0x85   : > { %v365_v32 = vadd.f32 %v363_v27, %v359_v28  ;;  %v366_v34 = vadd.f32 %v363_v27, %v360_v29  ;;  %v369_v48 = vstv %s3465_s10  ;;  %v376_v49 = vmul.f32 %v375_v45, %v3975_v6 }
  0x86   : > { %v367_v35 = vadd.f32 %v363_v27, %v361_v30  ;;  %v377_v50 = vmul.f32 %v375_v45, %v3977_v7  ;;  %v378_v51 = vmul.f32 %v375_v45, %v3979_v8  ;;  %v401_v52 = vstv %s3471_s18  ;;  %s4967_s18 = scalar_lea.hbm %s5020_s6, %s3509_s29 }
  0x87   : > { %v379_v53 = vmul.f32 %v375_v45, %v3981_v9  ;;  %v370_v54 = vmul.f32 %v369_v48, %v3975_v6  ;;  %v371_v55 = vmul.f32 %v369_v48, %v3977_v7  ;;  %v372_v56 = vmul.f32 %v369_v48, %v3979_v8 }
  0x88   : > { %v3467_v57 = vrot.slane %v376_v49, 9  ;;  %v402_v58 = vmul.f32 %v401_v52, %v3975_v6  ;;  %v3468_v59 = vrot.slane %v377_v50, 9  ;;  %v3469_v60 = vrot.slane %v378_v51, 9 }
  0x89   : > { %v403_v61 = vmul.f32 %v401_v52, %v3977_v7  ;;  %v404_v62 = vmul.f32 %v401_v52, %v3979_v8  ;;  %v373_v63 = vmul.f32 %v369_v48, %v3981_v9  ;;  %v3470_v0 = vrot.slane %v379_v53, 9 }
  0x8a   : > { %v4030_v33 = vpop.eup %3591  ;;  %v405_v1 = vmul.f32 %v401_v52, %v3981_v9  ;;  %v396_v3 = vadd.f32 %v3467_v57, %v370_v54  ;;  %v3472_v4 = vrot.slane %v402_v58, 10  ;;  %v397_v5 = vadd.f32 %v3468_v59, %v371_v55 }
  0x8b   : > { %v4033_v36 = vmul.f32 %v4030_v33, %v364_v31  ;;  %v398_v10 = vadd.f32 %v3469_v60, %v372_v56  ;;  %v3473_v11 = vrot.slane %v403_v61, 10  ;;  %v3474_v12 = vrot.slane %v404_v62, 10 }
  0x8c   : > { %v4035_v37 = vpop.eup %3593  ;;  %v399_v6 = vadd.f32 %v3470_v0, %v373_v63  ;;  %v3475_v13 = vrot.slane %v405_v1, 10  ;;  %v565_v14 = vlaneseq  ;;  %v422_v7 = vadd.f32 %v3472_v4, %v396_v3 }
  0x8d   : > { %v4037_v38 = vpop.eup %3595  ;;  %v4040_v39 = vmul.f32 %v4035_v37, %v365_v32  ;;  %v423_v15 = vadd.f32 %v3473_v11, %v397_v5  ;;  %v424_v8 = vadd.f32 %v3474_v12, %v398_v10  ;;  %v427_v16 = vstv %s3476_s11  ;;  %s3672_s11 = scalar_lea.vmem %s4969_s7, 1024 }
  0x8e   : > { %v4042_v40 = vpop.eup %3597  ;;  %v4045_v41 = vmul.f32 %v4037_v38, %v366_v34  ;;  %v549_v17 = vstv %s3493_s19  ;;  %v425_v18 = vadd.f32 %v3475_v13, %v399_v6  ;;  %v4062_v19 = vshrl.u32 %v565_v14, 7  ;;  %p3673_p10 = scmp.ne.s32.totalorder %s4969_s7, %s3672_s11  ;;  %s3755_s19 = smov [#allocation9]  }
  0x8f   : > { %v4048_v42 = vmul.f32 %v4042_v40, %v367_v35  ;;  %v3754_v9 = vmov 1966171168   ;;  %v428_v21 = vadd.f32 %v427_v16, %v422_v7  ;;  %v550_v22 = vmul.f32 %v549_v17, %v3995_v43 }
  0x90   : > { %v995_v20 = vunpack.c.l.s4 %v3754_v9  ;;  %v429_v23 = vadd.f32 %v427_v16, %v423_v15  ;;  %v430_v24 = vadd.f32 %v427_v16, %v424_v8  ;;  %v551_v25 = vmul.f32 %v549_v17, %v3997_v44  ;;  %p3674_p0 = pnand %p3673_p10, %p5064_p13 }
  0x91   : > { %v555_v26 = vstv %s3494_s26  ;;  %v431_v27 = vadd.f32 %v427_v16, %v425_v18  ;;  %v552_v28 = vmul.f32 %v549_v17, %v3999_v46  ;;  %v4068_v29 = vsub.s32 0, %v4062_v19  ;;  %s3676_s26 = sshll.u32 %s3755_s19, 4  ;;  %s3677_s26 = int_to_ptr.vmem [resolvable:$false] %s3676_s26 }
  0x92   : > { %v996_v30 = vunpack.c.0.s8 %v995_v20  ;;  %v553_v31 = vmul.f32 %v549_v17, %v4001_v47  ;;  %v532_v32 = vmul.f32 %v4030_v33, %v428_v21  ;;  %v556_v34 = vadd.f32 %v555_v26, %v550_v22  ;;  %p3675_p3 = pneg %p3674_p0  ;;  %p3679_p5 = scmp.lt.s32.totalorder %s4969_s7, %s3677_s26 }
  0x93   : > { %v533_v43 = vmul.f32 %v4035_v37, %v429_v23  ;;  %v534_v35 = vmul.f32 %v4037_v38, %v430_v24  ;;  %v537_v45 = vstv %s3491_s13  ;;  %v4075_v44 = vsub.s32 4, %v4062_v19  ;;  %s3678_s13 = scalar_lea.vmem %s3677_s26, 2048 }
  0x94   : > { %v557_v48 = vadd.f32 %v555_v26, %v551_v25  ;;  %v535_v46 = vmul.f32 %v4042_v40, %v431_v27  ;;  %v558_v49 = vadd.f32 %v555_v26, %v552_v28  ;;  %v4079_v50 = vsub.s32 %v996_v30, %v4062_v19  ;;  %p3680_p9 = scmp.lt.s32.totalorder %s3678_s13, %s3672_s11 }
  0x95   : > { %5046 = vst [vmem:[#allocation14_spill] sm:$0xff] %v4075_v44  ;;  %v559_v47 = vadd.f32 %v555_v26, %v553_v31  ;;  %v521_v51 = vstv %s3489_s14  ;;  %v538_v33 = vmul.f32 %v537_v45, %v532_v32  ;;  %v568_v52 = vrot.slane %v556_v34, %v4068_v29 }
  0x96   : > { %v539_v53 = vmul.f32 %v537_v45, %v533_v43  ;;  %v540_v37 = vmul.f32 %v537_v45, %v534_v35  ;;  %v543_v54 = vstv %s3492_s30  ;;  %v572_v38 = vrot.slane %v556_v34, %v4075_v44  ;;  %p3681_p1 = por %p3680_p9, %p3679_p5 }
  0x97   : > { %v576_v55 = vrot.slane %v557_v48, %v4068_v29  ;;  %v580_v56 = vrot.slane %v557_v48, %v4075_v44  ;;  %v541_v57 = vmul.f32 %v537_v45, %v535_v46  ;;  %v584_v40 = vrot.slane %v558_v49, %v4068_v29 }
  0x98   : > { %v588_v58 = vrot.slane %v558_v49, %v4075_v44  ;;  %v522_v59 = vmul.f32 %v521_v51, %v4033_v36  ;;  %v523_v60 = vmul.f32 %v521_v51, %v4040_v39  ;;  %v592_v61 = vrot.slane %v559_v47, %v4068_v29  ;;  %p3682_p6 = pnand %p3681_p1, %p3675_p3 }
  0x99   : > { %v524_v62 = vmul.f32 %v521_v51, %v4045_v41  ;;  %v544_v63 = vadd.f32 %v543_v54, %v538_v33  ;;  %v527_v0 = vstv %s3490_s17  ;;  %v596_v1 = vrot.slane %v559_v47, %v4075_v44 }
  0x9a   : > { %v608_v3 = vrot.slane %v568_v52, %v4068_v29  ;;  %v545_v4 = vadd.f32 %v543_v54, %v539_v53  ;;  %v546_v5 = vadd.f32 %v543_v54, %v540_v37  ;;  %v612_v10 = vrot.slane %v572_v38, %v4068_v29 }
  0x9b   : > { %v616_v11 = vrot.slane %v576_v55, %v4068_v29  ;;  %v525_v36 = vmul.f32 %v521_v51, %v4048_v42  ;;  %v547_v12 = vadd.f32 %v543_v54, %v541_v57  ;;  %v620_v39 = vrot.slane %v580_v56, %v4068_v29 }
  0x9c   : > { %v624_v6 = vrot.slane %v584_v40, %v4068_v29  ;;  %v528_v41 = vadd.f32 %v527_v0, %v522_v59  ;;  %v529_v13 = vadd.f32 %v527_v0, %v523_v60  ;;  %v628_v14 = vrot.slane %v588_v58, %v4068_v29 }
  0x9d   : > { %v632_v7 = vrot.slane %v592_v61, %v4068_v29  ;;  %v683_v15 = vrot.slane %v544_v63, %v4068_v29  ;;  %v530_v8 = vadd.f32 %v527_v0, %v524_v62  ;;  %v687_v16 = vrot.slane %v544_v63, %v4075_v44 }
  0x9e   : > { %v691_v17 = vrot.slane %v545_v4, %v4068_v29  ;;  %v695_v42 = vrot.slane %v545_v4, %v4075_v44  ;;  %v699_v18 = vrot.slane %v546_v5, %v4068_v29  ;;  %v703_v9 = vrot.slane %v546_v5, %v4075_v44 }
  0x9f   : > { %v707_v20 = vrot.slane %v547_v12, %v4068_v29  ;;  %v711_v21 = vrot.slane %v547_v12, %v4075_v44  ;;  %v531_v22 = vadd.f32 %v527_v0, %v525_v36  ;;  %v636_v23 = vrot.slane %v596_v1, %v4068_v29 }
  0xa0   : > { %v835_v24 = vrot.slane %v528_v41, %v4068_v29  ;;  %v839_v25 = vrot.slane %v528_v41, %v4075_v44  ;;  %v843_v26 = vrot.slane %v529_v13, %v4068_v29  ;;  %v4113_v27 = vrot.slane %v683_v15, %v4068_v29 }
  0xa1   : > { %v847_v28 = vrot.slane %v529_v13, %v4075_v44  ;;  %v851_v30 = vrot.slane %v530_v8, %v4068_v29  ;;  %v855_v31 = vrot.slane %v530_v8, %v4075_v44  ;;  %v4119_v32 = vrot.slane %v687_v16, %v4068_v29 }
  0xa2   : > { %v4122_v34 = vrot.slane %v691_v17, %v4068_v29  ;;  %v4125_v43 = vrot.slane %v695_v42, %v4068_v29  ;;  %v4128_v35 = vrot.slane %v699_v18, %v4068_v29  ;;  %v4131_v45 = vrot.slane %v703_v9, %v4068_v29 }
  0xa3   : > { %v4134_v48 = vrot.slane %v707_v20, %v4068_v29  ;;  %v4137_v46 = vrot.slane %v711_v21, %v4068_v29  ;;  %v859_v49 = vrot.slane %v531_v22, %v4068_v29  ;;  %v863_v47 = vrot.slane %v531_v22, %v4075_v44 }
  0xa4   : > { %v4142_v51 = vrot.slane %v835_v24, %v4068_v29  ;;  %v4145_v33 = vrot.slane %v839_v25, %v4068_v29  ;;  %v4148_v52 = vrot.slane %v843_v26, %v4068_v29  ;;  %v4151_v37 = vrot.slane %v847_v28, %v4068_v29 }
  0xa5   : > { %v4154_v54 = vrot.slane %v851_v30, %v4068_v29  ;;  %v4157_v38 = vrot.slane %v855_v31, %v4068_v29  ;;  %v4160_v55 = vsub.s32 1, %v4062_v19  ;;  %v4163_v4 = vrot.slane %v859_v49, %v4068_v29 }
  0xa6   : > { %v4166_v41 = vrot.slane %v863_v47, %v4068_v29 }
  0xe9   : > { %v640_v53 = vpop.permute.xlu0 %639 }
  0xea   : > { %v642_v56 = vsub.f32 %v608_v3, %v640_v53  ;;  %v643_v57 = vsub.f32 %v612_v10, %v640_v53  ;;  %v644_v40 = vsub.f32 %v616_v11, %v640_v53  ;;  %v645_v58 = vsub.f32 %v620_v39, %v640_v53 }
  0xeb   : > { %v646_v59 = vsub.f32 %v624_v6, %v640_v53  ;;  %v647_v60 = vsub.f32 %v628_v14, %v640_v53  ;;  %v648_v61 = vsub.f32 %v632_v7, %v640_v53  ;;  %v649_v62 = vsub.f32 %v636_v23, %v640_v53 }
  0xec   : > { %v650_v63 = vand.u32 2147483647, %v642_v56  ;;  %v651_v0 = vand.u32 2147483647, %v643_v57  ;;  %v652_v1 = vand.u32 2147483647, %v644_v40 }
  0xed   : > { %v653_v5 = vand.u32 2147483647, %v645_v58  ;;  %v654_v36 = vand.u32 2147483647, %v646_v59  ;;  %v655_v12 = vand.u32 2147483647, %v647_v60 }
  0xee   : > { %v656_v3 = vand.u32 2147483647, %v648_v61  ;;  %v657_v10 = vand.u32 2147483647, %v649_v62  ;;  %v658_v11 = vsub.f32 1.0, %v650_v63  ;;  %v659_v39 = vsub.f32 1.0, %v651_v0  ;;  %v755_v0 = vpop.permute.xlu0 %754 }
  0xef   : > { %v660_v6 = vsub.f32 1.0, %v652_v1  ;;  %v661_v13 = vsub.f32 1.0, %v653_v5  ;;  %v662_v14 = vsub.f32 1.0, %v654_v36  ;;  %v663_v7 = vsub.f32 1.0, %v655_v12 }
  0xf0   : > { %v664_v15 = vsub.f32 1.0, %v656_v3  ;;  %v665_v8 = vsub.f32 1.0, %v657_v10  ;;  %v666_v16 = vmax.f32 %v658_v11, 0.0  ;;  %v667_v17 = vmax.f32 %v659_v39, 0.0 }
  0xf1   : > { %v668_v42 = vmax.f32 %v660_v6, 0.0  ;;  %v669_v18 = vmax.f32 %v661_v13, 0.0  ;;  %v670_v9 = vmax.f32 %v662_v14, 0.0  ;;  %v671_v20 = vmax.f32 %v663_v7, 0.0  ;;  %v4192_v7 = vpop.permute.xlu1 %759 }
  0xf2   : > { %v672_v21 = vmax.f32 %v664_v15, 0.0  ;;  %v673_v22 = vmax.f32 %v665_v8, 0.0  ;;  %v986_v23 = vcombine.low %v666_v16, %v667_v17  ;;  %v987_v24 = vcombine.high %v666_v16, %v667_v17 }
  0xf3   : > { %v988_v25 = vcombine.low %v668_v42, %v669_v18  ;;  %v989_v26 = vcombine.high %v668_v42, %v669_v18  ;;  %v990_v28 = vcombine.low %v670_v9, %v671_v20  ;;  %v991_v30 = vcombine.high %v670_v9, %v671_v20 }
  0xf4   : > { %v992_v31 = vcombine.low %v672_v21, %v673_v22  ;;  %v993_v49 = vcombine.high %v672_v21, %v673_v22  ;;  %v1000_v47 = vrot.slane %v986_v23, %v4079_v50  ;;  %v1007_v53 = vrot.slane %v987_v24, %v4079_v50 }
  0xf5   : > { %v1014_v56 = vrot.slane %v988_v25, %v4079_v50  ;;  %v1021_v57 = vrot.slane %v989_v26, %v4079_v50  ;;  %v1028_v40 = vrot.slane %v990_v28, %v4079_v50  ;;  %v1035_v58 = vrot.slane %v991_v30, %v4079_v50 }
  0xf6   : > { %v1042_v59 = vrot.slane %v992_v31, %v4079_v50  ;;  %v1049_v60 = vrot.slane %v993_v49, %v4079_v50  ;;  %v4177_v61 = vsub.s32 3, %v4062_v19  ;;  %v4180_v62 = vsub.s32 2, %v4062_v19 }
  0xf7   : > { %v1050_v63 = vcombine.low %v1000_v47, %v1014_v56  ;;  %v4183_v1 = vsub.s32 5, %v4062_v19  ;;  %v4186_v5 = vsub.s32 7, %v4062_v19  ;;  %v4189_v36 = vsub.s32 6, %v4062_v19 }
  0xf8   : > { %v1051_v12 = vcombine.high %v1000_v47, %v1014_v56  ;;  %v1052_v3 = vcombine.low %v1007_v53, %v1021_v57  ;;  %v1054_v10 = vcombine.low %v1028_v40, %v1042_v59  ;;  %v1056_v11 = vcombine.low %v1035_v58, %v1049_v60 }
  0xf9   : > { %5047 = vst [vmem:[#allocation15_spill] sm:$0xff] %v4189_v36  ;;  %v1053_v39 = vcombine.high %v1007_v53, %v1021_v57  ;;  %v1055_v6 = vcombine.high %v1028_v40, %v1042_v59  ;;  %v1057_v13 = vcombine.high %v1035_v58, %v1049_v60  ;;  %v1064_v14 = vrot.slane %v1050_v63, %v4079_v50 }
  0xfa   : > { %v1092_v15 = vrot.slane %v1054_v10, %v4079_v50  ;;  %v762_v8 = vsub.f32 %v4113_v27, %v755_v0  ;;  %v763_v16 = vsub.f32 %v4119_v32, %v755_v0  ;;  %v770_v19 = vsub.f32 %v4113_v27, %v4192_v7 }
  0xfb   : > { %v764_v17 = vsub.f32 %v4122_v34, %v755_v0  ;;  %v765_v42 = vsub.f32 %v4125_v43, %v755_v0  ;;  %v766_v18 = vsub.f32 %v4128_v35, %v755_v0  ;;  %v771_v9 = vsub.f32 %v4119_v32, %v4192_v7 }
  0xfc   : > { %v1071_v20 = vrot.slane %v1052_v3, %v4079_v50  ;;  %v1078_v21 = vrot.slane %v1051_v12, %v4079_v50  ;;  %v1099_v22 = vrot.slane %v1056_v11, %v4079_v50  ;;  %v767_v23 = vsub.f32 %v4131_v45, %v755_v0 }
  0xfd   : > { %v1085_v24 = vrot.slane %v1053_v39, %v4079_v50  ;;  %v1106_v27 = vrot.slane %v1055_v6, %v4079_v50  ;;  %v1113_v25 = vrot.slane %v1057_v13, %v4079_v50  ;;  %v4211_v26 = vcombine.low %v1064_v14, %v1092_v15 }
  0xfe   : > { %v768_v28 = vsub.f32 %v4134_v48, %v755_v0  ;;  %v769_v32 = vsub.f32 %v4137_v46, %v755_v0  ;;  %v778_v30 = vand.u32 2147483647, %v762_v8  ;;  %v779_v31 = vand.u32 2147483647, %v763_v16 }
  0xff   : > { %v4215_v49 = vcombine.high %v1064_v14, %v1092_v15  ;;  %v780_v47 = vand.u32 2147483647, %v764_v17  ;;  %v781_v53 = vand.u32 2147483647, %v765_v42  ;;  %v782_v56 = vand.u32 2147483647, %v766_v18 }
 0x100   : > { %v4217_v57 = vcombine.low %v1071_v20, %v1099_v22  ;;  %v783_v40 = vand.u32 2147483647, %v767_v23  ;;  %v784_v58 = vand.u32 2147483647, %v768_v28  ;;  %v785_v59 = vand.u32 2147483647, %v769_v32 }
 0x101   : > { %v4219_v60 = vcombine.high %v1071_v20, %v1099_v22  ;;  %v794_v63 = vsub.f32 1.0, %v778_v30  ;;  %v795_v12 = vsub.f32 1.0, %v779_v31  ;;  %v796_v3 = vsub.f32 1.0, %v780_v47  ;;  %v912_v30 = vpop.permute.xlu0 %911 }
 0x102   : > { %v4221_v10 = vcombine.low %v1078_v21, %v1106_v27  ;;  %v4223_v0 = vcombine.high %v1078_v21, %v1106_v27  ;;  %v4225_v11 = vcombine.low %v1085_v24, %v1113_v25  ;;  %v772_v39 = vsub.f32 %v4122_v34, %v4192_v7 }
 0x103   : > { %v4229_v6 = vcombine.high %v1085_v24, %v1113_v25  ;;  %v797_v13 = vsub.f32 1.0, %v781_v53  ;;  %v798_v14 = vsub.f32 1.0, %v782_v56  ;;  %v773_v15 = vsub.f32 %v4125_v43, %v4192_v7 }
 0x104   : > { %v799_v8 = vsub.f32 1.0, %v783_v40  ;;  %v800_v16 = vsub.f32 1.0, %v784_v58  ;;  %v801_v17 = vsub.f32 1.0, %v785_v59  ;;  %v4233_v42 = vmax.f32 %v794_v63, 0.0 }
 0x105   : > { %v4235_v18 = vmax.f32 %v795_v12, 0.0  ;;  %v4237_v20 = vmax.f32 %v796_v3, 0.0  ;;  %v774_v21 = vsub.f32 %v4128_v35, %v4192_v7  ;;  %v775_v34 = vsub.f32 %v4131_v45, %v4192_v7  ;;  %v4272_v3 = vpop.permute.xlu1 %906 }
 0x106   : > { %v776_v22 = vsub.f32 %v4134_v48, %v4192_v7  ;;  %v786_v23 = vand.u32 2147483647, %v770_v19  ;;  %v787_v43 = vand.u32 2147483647, %v771_v9  ;;  %v788_v24 = vand.u32 2147483647, %v772_v39 }
 0x107   : > { %v4245_v27 = vmax.f32 %v797_v13, 0.0  ;;  %v777_v25 = vsub.f32 %v4137_v46, %v4192_v7  ;;  %v789_v28 = vand.u32 2147483647, %v773_v15  ;;  %v4249_v32 = vand.u32 2147483647, %v774_v21 }
 0x108   : > { %v4251_v31 = vmax.f32 %v798_v14, 0.0  ;;  %v4253_v35 = vmax.f32 %v799_v8, 0.0  ;;  %v802_v45 = vsub.f32 1.0, %v786_v23  ;;  %v803_v47 = vsub.f32 1.0, %v787_v43 }
 0x109   : > { %v4255_v53 = vmax.f32 %v800_v16, 0.0  ;;  %v4257_v48 = vmax.f32 %v801_v17, 0.0  ;;  %v804_v19 = vsub.f32 1.0, %v788_v24  ;;  %v805_v9 = vsub.f32 1.0, %v789_v28 }
 0x10a   : > { %5048 = vst [vmem:[#allocation16_spill] sm:$0xff] %v4251_v31  ;;  %5049 = vst [vmem:[#allocation17_spill] sm:$0xff] %v4253_v35  ;;  %v4259_v56 = vand.u32 2147483647, %v775_v34  ;;  %v4261_v40 = vand.u32 2147483647, %v776_v22  ;;  %v922_v46 = vsub.f32 %v4142_v51, %v912_v30  ;;  %v923_v7 = vsub.f32 %v4145_v33, %v912_v30 }
 0x10b   : > { %5050 = vst [vmem:[#allocation18_spill] sm:$0xff] %v4255_v53  ;;  %5051 = vst [vmem:[#allocation19_spill] sm:$0xff] %v4257_v48  ;;  %v4265_v58 = vand.u32 2147483647, %v777_v25  ;;  %v4268_v63 = vmax.f32 %v802_v45, 0.0  ;;  %v4270_v12 = vmax.f32 %v803_v47, 0.0  ;;  %v924_v14 = vsub.f32 %v4148_v52, %v912_v30 }
 0x10c   : > { %v4274_v39 = vmax.f32 %v804_v19, 0.0  ;;  %v4276_v13 = vmax.f32 %v805_v9, 0.0  ;;  %v925_v15 = vsub.f32 %v4151_v37, %v912_v30  ;;  %v926_v8 = vsub.f32 %v4154_v54, %v912_v30 }
 0x10d   : > { %v927_v16 = vsub.f32 %v4157_v38, %v912_v30  ;;  %v928_v17 = vsub.f32 %v4163_v4, %v912_v30  ;;  %v929_v21 = vsub.f32 %v4166_v41, %v912_v30  ;;  %v938_v34 = vand.u32 2147483647, %v922_v46 }
 0x10e   : > { %v939_v22 = vand.u32 2147483647, %v923_v7  ;;  %v940_v23 = vand.u32 2147483647, %v924_v14  ;;  %v941_v24 = vand.u32 2147483647, %v925_v15 }
 0x10f   : > { %v942_v25 = vand.u32 2147483647, %v926_v8  ;;  %v943_v28 = vand.u32 2147483647, %v927_v16  ;;  %v944_v47 = vand.u32 2147483647, %v928_v17 }
 0x110   : > { %v945_v19 = vand.u32 2147483647, %v929_v21  ;;  %v954_v9 = vsub.f32 1.0, %v938_v34  ;;  %v955_v2 = vsub.f32 1.0, %v939_v22  ;;  %v956_v59 = vsub.f32 1.0, %v940_v23 }
 0x111   : > { %v957_v53 = vsub.f32 1.0, %v941_v24  ;;  %v958_v31 = vsub.f32 1.0, %v942_v25  ;;  %v959_v30 = vsub.f32 1.0, %v943_v28  ;;  %v960_v46 = vsub.f32 1.0, %v944_v47 }
 0x112   : > { %v961_v7 = vsub.f32 1.0, %v945_v19  ;;  %v970_v14 = vmax.f32 %v954_v9, 0.0  ;;  %v971_v36 = vmax.f32 %v955_v2, 0.0  ;;  %v972_v44 = vmax.f32 %v956_v59, 0.0 }
 0x113   : > { %v973_v43 = vmax.f32 %v957_v53, 0.0  ;;  %v974_v15 = vmax.f32 %v958_v31, 0.0  ;;  %v975_v8 = vmax.f32 %v959_v30, 0.0  ;;  %v976_v16 = vmax.f32 %v960_v46, 0.0 }
 0x114   : > { %v977_v48 = vmax.f32 %v961_v7, 0.0  ;;  %v2302_v35 = vcombine.low %v970_v14, %v971_v36  ;;  %v2303_v45 = vcombine.high %v970_v14, %v971_v36 }
 0x115   : > { %v2304_v17 = vcombine.low %v972_v44, %v973_v43  ;;  %v2305_v21 = vcombine.high %v972_v44, %v973_v43  ;;  %v2306_v34 = vcombine.low %v974_v15, %v975_v8  ;;  %v2307_v22 = vcombine.high %v974_v15, %v975_v8 }
 0x116   : > { %v2308_v23 = vcombine.low %v976_v16, %v977_v48  ;;  %v2309_v24 = vcombine.high %v976_v16, %v977_v48  ;;  %v2316_v25 = vrot.slane %v2302_v35, %v4079_v50  ;;  %v2323_v28 = vrot.slane %v2303_v45, %v4079_v50 }
 0x117   : > { %v2330_v2 = vrot.slane %v2304_v17, %v4079_v50  ;;  %v2337_v53 = vrot.slane %v2305_v21, %v4079_v50  ;;  %v2344_v31 = vrot.slane %v2306_v34, %v4079_v50  ;;  %v2351_v59 = vrot.slane %v2307_v22, %v4079_v50 }
 0x118   : > { %v2358_v36 = vrot.slane %v2308_v23, %v4079_v50  ;;  %v2365_v44 = vrot.slane %v2309_v24, %v4079_v50  ;;  %v916_v43 = vsub.f32 %v4148_v52, %v4272_v3  ;;  %v917_v35 = vsub.f32 %v4151_v37, %v4272_v3 }
 0x119   : > { %v2366_v48 = vcombine.low %v2316_v25, %v2330_v2  ;;  %v2367_v45 = vcombine.high %v2316_v25, %v2330_v2  ;;  %v2368_v47 = vcombine.low %v2323_v28, %v2337_v53  ;;  %v2369_v19 = vcombine.high %v2323_v28, %v2337_v53 }
 0x11a   : > { %v2370_v9 = vcombine.low %v2344_v31, %v2358_v36  ;;  %v2371_v30 = vcombine.high %v2344_v31, %v2358_v36  ;;  %v2372_v46 = vcombine.low %v2351_v59, %v2365_v44  ;;  %v2373_v7 = vcombine.high %v2351_v59, %v2365_v44 }
 0x11b   : > { %v2380_v14 = vrot.slane %v2366_v48, %v4079_v50  ;;  %v2387_v15 = vrot.slane %v2368_v47, %v4079_v50  ;;  %v2394_v8 = vrot.slane %v2367_v45, %v4079_v50  ;;  %v2401_v16 = vrot.slane %v2369_v19, %v4079_v50 }
 0x11c   : > { %v2408_v52 = vrot.slane %v2370_v9, %v4079_v50  ;;  %v2415_v37 = vrot.slane %v2372_v46, %v4079_v50  ;;  %v2422_v17 = vrot.slane %v2371_v30, %v4079_v50  ;;  %v2429_v21 = vrot.slane %v2373_v7, %v4079_v50 }
 0x11d   : > { %v918_v34 = vsub.f32 %v4154_v54, %v4272_v3  ;;  %v919_v22 = vsub.f32 %v4157_v38, %v4272_v3  ;;  %v920_v23 = vsub.f32 %v4163_v4, %v4272_v3  ;;  %v921_v24 = vsub.f32 %v4166_v41, %v4272_v3 }
 0x11e   : > { %v4316_v25 = vcombine.low %v2380_v14, %v2408_v52  ;;  %v4318_v28 = vcombine.high %v2380_v14, %v2408_v52  ;;  %v4320_v2 = vcombine.low %v2387_v15, %v2415_v37  ;;  %v4322_v53 = vcombine.high %v2387_v15, %v2415_v37 }
 0x11f   : > { %v4324_v31 = vcombine.low %v2394_v8, %v2422_v17  ;;  %v4326_v54 = vcombine.high %v2394_v8, %v2422_v17  ;;  %v4328_v59 = vcombine.low %v2401_v16, %v2429_v21  ;;  %v4330_v38 = vcombine.high %v2401_v16, %v2429_v21 }
 0x120   : > { %v5053_v4 = vsub.f32 %v4142_v51, %v4272_v3  ;;  %v5054_v36 = vsub.f32 %v4145_v33, %v4272_v3  ;;  %v932_v48 = vand.u32 2147483647, %v916_v43  ;;  %v1129_v45 = vrot.slane %v4211_v26, %v4160_v55 }
 0x121   : > { %5052 = vst [vmem:[#allocation20_spill] sm:$0xff] %v4330_v38  ;;  %v933_v47 = vand.u32 2147483647, %v917_v35  ;;  %v934_v19 = vand.u32 2147483647, %v918_v34  ;;  %v1137_v30 = vrot.slane %v4211_v26, %v4177_v61 }
 0x122   : > { %v930_v41 = vand.u32 2147483647, %v5053_v4  ;;  %v931_v44 = vand.u32 2147483647, %v5054_v36  ;;  %v935_v9 = vand.u32 2147483647, %v919_v22 }
 0x123   : > { %v936_v46 = vand.u32 2147483647, %v920_v23  ;;  %v937_v7 = vand.u32 2147483647, %v921_v24  ;;  %v948_v51 = vsub.f32 1.0, %v932_v48  ;;  %v949_v8 = vsub.f32 1.0, %v933_v47 }
 0x124   : > { %v946_v14 = vsub.f32 1.0, %v930_v41  ;;  %v947_v15 = vsub.f32 1.0, %v931_v44  ;;  %v950_v16 = vsub.f32 1.0, %v934_v19  ;;  %v951_v52 = vsub.f32 1.0, %v935_v9 }
 0x125   : > { %v952_v33 = vsub.f32 1.0, %v936_v46  ;;  %v953_v3 = vsub.f32 1.0, %v937_v7  ;;  %v964_v17 = vmax.f32 %v948_v51, 0.0  ;;  %v965_v21 = vmax.f32 %v949_v8, 0.0 }
 0x126   : > { %v962_v43 = vmax.f32 %v946_v14, 0.0  ;;  %v963_v37 = vmax.f32 %v947_v15, 0.0  ;;  %v966_v35 = vmax.f32 %v950_v16, 0.0  ;;  %v967_v34 = vmax.f32 %v951_v52, 0.0 }
 0x127   : > { %v968_v22 = vmax.f32 %v952_v33, 0.0  ;;  %v969_v4 = vmax.f32 %v953_v3, 0.0  ;;  %v2168_v23 = vcombine.low %v964_v17, %v965_v21  ;;  %v2169_v24 = vcombine.high %v964_v17, %v965_v21 }
 0x128   : > { %v2166_v36 = vcombine.low %v962_v43, %v963_v37  ;;  %v2167_v38 = vcombine.high %v962_v43, %v963_v37  ;;  %v2170_v41 = vcombine.low %v966_v35, %v967_v34  ;;  %v2171_v44 = vcombine.high %v966_v35, %v967_v34 }
 0x129   : > { %v2172_v48 = vcombine.low %v968_v22, %v969_v4  ;;  %v2173_v47 = vcombine.high %v968_v22, %v969_v4  ;;  %v2194_v46 = vrot.slane %v2168_v23, %v4079_v50  ;;  %v2201_v7 = vrot.slane %v2169_v24, %v4079_v50 }
 0x12a   : > { %v2180_v19 = vrot.slane %v2166_v36, %v4079_v50  ;;  %v2187_v9 = vrot.slane %v2167_v38, %v4079_v50  ;;  %v2208_v14 = vrot.slane %v2170_v41, %v4079_v50  ;;  %v2215_v15 = vrot.slane %v2171_v44, %v4079_v50 }
 0x12b   : > { %v2222_v51 = vrot.slane %v2172_v48, %v4079_v50  ;;  %v2229_v8 = vrot.slane %v2173_v47, %v4079_v50  ;;  %v1443_v16 = vmul.f32 %v1129_v45, %v4235_v18  ;;  %v1451_v52 = vmul.f32 %v1129_v45, %v4270_v12 }
 0x12c   : > { %v2230_v33 = vcombine.low %v2180_v19, %v2194_v46  ;;  %v2231_v3 = vcombine.high %v2180_v19, %v2194_v46  ;;  %v2232_v43 = vcombine.low %v2187_v9, %v2201_v7  ;;  %v2233_v38 = vcombine.high %v2187_v9, %v2201_v7 }
 0x12d   : > { %v2234_v37 = vcombine.low %v2208_v14, %v2222_v51  ;;  %v2235_v17 = vcombine.high %v2208_v14, %v2222_v51  ;;  %v2236_v21 = vcombine.low %v2215_v15, %v2229_v8  ;;  %v2237_v35 = vcombine.high %v2215_v15, %v2229_v8 }
 0x12e   : > { %v2244_v34 = vrot.slane %v2230_v33, %v4079_v50  ;;  %v2251_v22 = vrot.slane %v2232_v43, %v4079_v50  ;;  %v2258_v4 = vrot.slane %v2231_v3, %v4079_v50  ;;  %v2265_v36 = vrot.slane %v2233_v38, %v4079_v50 }
 0x12f   : > { %v2272_v23 = vrot.slane %v2234_v37, %v4079_v50  ;;  %v2279_v45 = vrot.slane %v2236_v21, %v4079_v50  ;;  %v2286_v24 = vrot.slane %v2235_v17, %v4079_v50  ;;  %v2293_v41 = vrot.slane %v2237_v35, %v4079_v50 }
 0x130   : > { %v1587_v44 = vpack.c.bf16 %v1451_v52, %v1443_v16  ;;  %v1445_v48 = vmul.f32 %v1137_v30, %v4245_v27  ;;  %v1453_v47 = vmul.f32 %v1137_v30, %v4276_v13  ;;  %v1125_v19 = vrot.slane %v4211_v26, %v4068_v29 }
 0x131   : > { %v4364_v9 = vcombine.low %v2244_v34, %v2272_v23  ;;  %v4366_v46 = vcombine.high %v2244_v34, %v2272_v23  ;;  %v4368_v7 = vcombine.low %v2251_v22, %v2279_v45  ;;  %v4370_v14 = vcombine.high %v2251_v22, %v2279_v45 }
 0x132   : > { %v4372_v15 = vcombine.low %v2258_v4, %v2286_v24  ;;  %v4374_v51 = vcombine.high %v2258_v4, %v2286_v24  ;;  %v4376_v50 = vcombine.low %v2265_v36, %v2293_v41  ;;  %v4378_v8 = vcombine.high %v2265_v36, %v2293_v41  ;;  %1698 = vmatprep.subr.bf16.mxu0 %v1587_v44 }
 0x133   : > { %v1589_v30 = vpack.c.bf16 %v1453_v47, %v1445_v48  ;;  %v1442_v16 = vmul.f32 %v1125_v19, %v4233_v42  ;;  %v1450_v52 = vmul.f32 %v1125_v19, %v4268_v63  ;;  %v1133_v33 = vrot.slane %v4211_v26, %v4180_v62 }
 0x134   : > { %v1161_v3 = vrot.slane %v4221_v10, %v4160_v55  ;;  %v1169_v43 = vrot.slane %v4221_v10, %v4177_v61  ;;  %v1157_v38 = vrot.slane %v4221_v10, %v4068_v29  ;;  %v1165_v37 = vrot.slane %v4221_v10, %v4180_v62 }
 0x135   : > { %1811 = vmatprep.subr.bf16.mxu1 %v1589_v30  ;;  %v1586_v17 = vpack.c.bf16 %v1450_v52, %v1442_v16  ;;  %v1444_v21 = vmul.f32 %v1133_v33, %v4237_v20  ;;  %v1452_v35 = vmul.f32 %v1133_v33, %v4274_v39  ;;  %v1193_v34 = vrot.slane %v4215_v49, %v4160_v55 }
 0x136   : > { %v1459_v22 = vmul.f32 %v1161_v3, %v4235_v18  ;;  %v1467_v4 = vmul.f32 %v1161_v3, %v4270_v12  ;;  %v1461_v36 = vmul.f32 %v1169_v43, %v4245_v27  ;;  %v1469_v23 = vmul.f32 %v1169_v43, %v4276_v13 }
 0x137   : > { %1699 = vmatpush1.bf16.msra.mxu0 %v1586_v17  ;;  %v1588_v45 = vpack.c.bf16 %v1452_v35, %v1444_v21  ;;  %v1458_v24 = vmul.f32 %v1157_v38, %v4233_v42  ;;  %v1466_v41 = vmul.f32 %v1157_v38, %v4268_v63  ;;  %v1460_v44 = vmul.f32 %v1165_v37, %v4237_v20 }
 0x138   : > { %v1595_v48 = vpack.c.bf16 %v1467_v4, %v1459_v22  ;;  %v1597_v47 = vpack.c.bf16 %v1469_v23, %v1461_v36  ;;  %v1468_v19 = vmul.f32 %v1165_v37, %v4274_v39  ;;  %v1475_v30 = vmul.f32 %v1193_v34, %v4235_v18 }
 0x139   : > { %1812 = vmatpush1.bf16.msra.mxu1 %v1588_v45  ;;  %v1594_v16 = vpack.c.bf16 %v1466_v41, %v1458_v24  ;;  %v1483_v52 = vmul.f32 %v1193_v34, %v4270_v12  ;;  %v1201_v33 = vrot.slane %v4215_v49, %v4177_v61  ;;  %v1189_v3 = vrot.slane %v4215_v49, %v4068_v29 }
 0x13a   : > { %v807_v43 = vsub.f32 1.0, %v4259_v56  ;;  %1700 = vmatprep.subr.bf16.mxu0 %v1595_v48  ;;  %1813 = vmatprep.subr.bf16.mxu1 %v1597_v47  ;;  %v1596_v38 = vpack.c.bf16 %v1468_v19, %v1460_v44  ;;  %v1197_v37 = vrot.slane %v4215_v49, %v4180_v62  ;;  %v1225_v17 = vrot.slane %v4223_v0, %v4160_v55 }
 0x13b   : > { %1701 = vmatpush1.bf16.msra.mxu0 %v1594_v16  ;;  %v1603_v21 = vpack.c.bf16 %v1483_v52, %v1475_v30  ;;  %v1477_v35 = vmul.f32 %v1201_v33, %v4245_v27  ;;  %v1485_v34 = vmul.f32 %v1201_v33, %v4276_v13  ;;  %v1474_v22 = vmul.f32 %v1189_v3, %v4233_v42 }
 0x13c   : > { %v1482_v4 = vmul.f32 %v1189_v3, %v4268_v63  ;;  %v1476_v36 = vmul.f32 %v1197_v37, %v4237_v20  ;;  %v1484_v23 = vmul.f32 %v1197_v37, %v4274_v39  ;;  %v1491_v45 = vmul.f32 %v1225_v17, %v4235_v18 }
 0x13d   : > { %v808_v24 = vsub.f32 1.0, %v4261_v40  ;;  %1814 = vmatpush1.bf16.msra.mxu1 %v1596_v38  ;;  %1702 = vmatprep.subr.bf16.mxu0 %v1603_v21  ;;  %v1605_v41 = vpack.c.bf16 %v1485_v34, %v1477_v35  ;;  %v1499_v44 = vmul.f32 %v1225_v17, %v4270_v12  ;;  %v1233_v48 = vrot.slane %v4223_v0, %v4177_v61  ;;  %v4525_v40 = vld [vmem:[#allocation7] sm:$0xff]  }
 0x13e   : > { %v1602_v47 = vpack.c.bf16 %v1482_v4, %v1474_v22  ;;  %v1604_v19 = vpack.c.bf16 %v1484_v23, %v1476_v36  ;;  %v1221_v30 = vrot.slane %v4223_v0, %v4068_v29  ;;  %v1229_v16 = vrot.slane %v4223_v0, %v4180_v62 }
 0x13f   : > { %1815 = vmatprep.subr.bf16.mxu1 %v1605_v41  ;;  %v1611_v52 = vpack.c.bf16 %v1499_v44, %v1491_v45  ;;  %v1493_v33 = vmul.f32 %v1233_v48, %v4245_v27  ;;  %v1501_v3 = vmul.f32 %v1233_v48, %v4276_v13  ;;  %v1257_v38 = vrot.slane %v4217_v57, %v4160_v55 }
 0x140   : > { %1703 = vmatpush1.bf16.msra.mxu0 %v1602_v47  ;;  %v1490_v37 = vmul.f32 %v1221_v30, %v4233_v42  ;;  %v1498_v17 = vmul.f32 %v1221_v30, %v4268_v63  ;;  %v1492_v21 = vmul.f32 %v1229_v16, %v4237_v20  ;;  %v1500_v35 = vmul.f32 %v1229_v16, %v4274_v39 }
 0x141   : > { %v809_v34 = vsub.f32 1.0, %v4265_v58  ;;  %1816 = vmatpush1.bf16.msra.mxu1 %v1604_v19  ;;  %1704 = vmatprep.subr.bf16.mxu0 %v1611_v52  ;;  %v1613_v22 = vpack.c.bf16 %v1501_v3, %v1493_v33  ;;  %v1507_v4 = vmul.f32 %v1257_v38, %v4235_v18  ;;  %v1515_v36 = vmul.f32 %v1257_v38, %v4270_v12 }
 0x142   : > { %v1610_v23 = vpack.c.bf16 %v1498_v17, %v1490_v37  ;;  %v1612_v45 = vpack.c.bf16 %v1500_v35, %v1492_v21  ;;  %v1265_v41 = vrot.slane %v4217_v57, %v4177_v61  ;;  %v1253_v44 = vrot.slane %v4217_v57, %v4068_v29 }
 0x143   : > { %1817 = vmatprep.subr.bf16.mxu1 %v1613_v22  ;;  %v1619_v48 = vpack.c.bf16 %v1515_v36, %v1507_v4  ;;  %v1261_v47 = vrot.slane %v4217_v57, %v4180_v62  ;;  %v1289_v19 = vrot.slane %v4225_v11, %v4160_v55  ;;  %v1297_v30 = vrot.slane %v4225_v11, %v4177_v61 }
 0x144   : > { %1705 = vmatpush1.bf16.msra.mxu0 %v1610_v23  ;;  %v1509_v16 = vmul.f32 %v1265_v41, %v4245_v27  ;;  %v1517_v52 = vmul.f32 %v1265_v41, %v4276_v13  ;;  %v1506_v33 = vmul.f32 %v1253_v44, %v4233_v42  ;;  %v1514_v3 = vmul.f32 %v1253_v44, %v4268_v63 }
 0x145   : > { %v5055_v38 = vsub.f32 1.0, %v4249_v32  ;;  %1818 = vmatpush1.bf16.msra.mxu1 %v1612_v45  ;;  %1706 = vmatprep.subr.bf16.mxu0 %v1619_v48  ;;  %v1508_v17 = vmul.f32 %v1261_v47, %v4237_v20  ;;  %v1516_v21 = vmul.f32 %v1261_v47, %v4274_v39  ;;  %v1523_v35 = vmul.f32 %v1289_v19, %v4235_v18 }
 0x146   : > { %v1621_v22 = vpack.c.bf16 %v1517_v52, %v1509_v16  ;;  %v1618_v4 = vpack.c.bf16 %v1514_v3, %v1506_v33  ;;  %v1531_v36 = vmul.f32 %v1289_v19, %v4270_v12  ;;  %v1525_v23 = vmul.f32 %v1297_v30, %v4245_v27 }
 0x147   : > { %v4457_v37 = vmax.f32 %v5055_v38, 0.0  ;;  %v1620_v41 = vpack.c.bf16 %v1516_v21, %v1508_v17  ;;  %v1533_v44 = vmul.f32 %v1297_v30, %v4276_v13  ;;  %v1285_v32 = vrot.slane %v4225_v11, %v4068_v29 }
 0x148   : > { %v1293_v45 = vrot.slane %v4225_v11, %v4180_v62  ;;  %v4471_v48 = vmax.f32 %v807_v43, 0.0  ;;  %1819 = vmatprep.subr.bf16.mxu1 %v1621_v22  ;;  %1707 = vmatpush1.bf16.msra.mxu0 %v1618_v4  ;;  %v1627_v47 = vpack.c.bf16 %v1531_v36, %v1523_v35  ;;  %v1321_v19 = vrot.slane %v4219_v60, %v4160_v55 }
 0x149   : > { %v1329_v16 = vrot.slane %v4219_v60, %v4177_v61  ;;  %1820 = vmatpush1.bf16.msra.mxu1 %v1620_v41  ;;  %v1629_v30 = vpack.c.bf16 %v1533_v44, %v1525_v23  ;;  %v1522_v52 = vmul.f32 %v1285_v32, %v4233_v42  ;;  %v1530_v33 = vmul.f32 %v1285_v32, %v4268_v63 }
 0x14a   : > { %v1524_v3 = vmul.f32 %v1293_v45, %v4237_v20  ;;  %1708 = vmatprep.subr.bf16.mxu0 %v1627_v47  ;;  %v1532_v56 = vmul.f32 %v1293_v45, %v4274_v39  ;;  %v1539_v43 = vmul.f32 %v1321_v19, %v4235_v18  ;;  %v1547_v38 = vmul.f32 %v1321_v19, %v4270_v12 }
 0x14b   : > { %v1541_v17 = vmul.f32 %v1329_v16, %v4245_v27  ;;  %1821 = vmatprep.subr.bf16.mxu1 %v1629_v30  ;;  %v1626_v21 = vpack.c.bf16 %v1530_v33, %v1522_v52  ;;  %v1549_v35 = vmul.f32 %v1329_v16, %v4276_v13  ;;  %v1317_v22 = vrot.slane %v4219_v60, %v4068_v29 }
 0x14c   : > { %v1325_v4 = vrot.slane %v4219_v60, %v4180_v62  ;;  %v1628_v36 = vpack.c.bf16 %v1532_v56, %v1524_v3  ;;  %v1635_v23 = vpack.c.bf16 %v1547_v38, %v1539_v43  ;;  %v1353_v41 = vrot.slane %v4229_v6, %v4160_v55 }
 0x14d   : > { %v1361_v44 = vrot.slane %v4229_v6, %v4177_v61  ;;  %1709 = vmatpush1.bf16.msra.mxu0 %v1626_v21  ;;  %v1637_v32 = vpack.c.bf16 %v1549_v35, %v1541_v17  ;;  %v1538_v45 = vmul.f32 %v1317_v22, %v4233_v42  ;;  %v1546_v47 = vmul.f32 %v1317_v22, %v4268_v63 }
 0x14e   : > { %v1540_v19 = vmul.f32 %v1325_v4, %v4237_v20  ;;  %v4498_v16 = vmax.f32 %v809_v34, 0.0  ;;  %1822 = vmatpush1.bf16.msra.mxu1 %v1628_v36  ;;  %1710 = vmatprep.subr.bf16.mxu0 %v1635_v23  ;;  %v1548_v30 = vmul.f32 %v1325_v4, %v4274_v39  ;;  %v1555_v52 = vmul.f32 %v1353_v41, %v4235_v18  ;;  %v5056_v36 = vld [vmem:[#allocation17_spill] sm:$0xff] }
 0x14f   : > { %v1563_v33 = vmul.f32 %v1353_v41, %v4270_v12  ;;  %1823 = vmatprep.subr.bf16.mxu1 %v1637_v32  ;;  %v1634_v3 = vpack.c.bf16 %v1546_v47, %v1538_v45  ;;  %v1557_v56 = vmul.f32 %v1361_v44, %v4245_v27  ;;  %v1565_v43 = vmul.f32 %v1361_v44, %v4276_v13 }
 0x150   : > { %v1349_v38 = vrot.slane %v4229_v6, %v4068_v29  ;;  %v1636_v58 = vpack.c.bf16 %v1548_v30, %v1540_v19  ;;  %v1357_v17 = vrot.slane %v4229_v6, %v4180_v62  ;;  %v1145_v21 = vrot.slane %v4211_v26, %v4183_v1  ;;  %v5059_v19 = vld [vmem:[#allocation15_spill] sm:$0xff] }
 0x151   : > { %v1643_v34 = vpack.c.bf16 %v1563_v33, %v1555_v52  ;;  %1711 = vmatpush1.bf16.msra.mxu0 %v1634_v3  ;;  %v1645_v18 = vpack.c.bf16 %v1565_v43, %v1557_v56  ;;  %v1153_v27 = vrot.slane %v4211_v26, %v4186_v5  ;;  %v4517_v13 = vmax.f32 %v808_v24, 0.0  ;;  %v5058_v24 = vld [vmem:[#allocation14_spill] sm:$0xff]  ;;  %v5060_v56 = vld [vmem:[#allocation16_spill] sm:$0xff] }
 0x152   : > { %v1554_v12 = vmul.f32 %v1349_v38, %v4233_v42  ;;  %v1562_v35 = vmul.f32 %v1349_v38, %v4268_v63  ;;  %1824 = vmatpush1.bf16.msra.mxu1 %v1636_v58  ;;  %v1556_v22 = vmul.f32 %v1357_v17, %v4237_v20  ;;  %v1564_v4 = vmul.f32 %v1357_v17, %v4274_v39  ;;  %v5057_v63 = vld [vmem:[#allocation19_spill] sm:$0xff]  ;;  %v5061_v58 = vld [vmem:[#allocation18_spill] sm:$0xff] }
 0x153   : > { %1712 = vmatprep.subr.bf16.mxu0 %v1643_v34  ;;  %v1447_v23 = vmul.f32 %v1145_v21, %v5056_v36  ;;  %1825 = vmatprep.subr.bf16.mxu1 %v1645_v18  ;;  %v1455_v42 = vmul.f32 %v1145_v21, %v4471_v48  ;;  %v1449_v44 = vmul.f32 %v1153_v27, %v5057_v63 }
 0x154   : > { %v1642_v41 = vpack.c.bf16 %v1562_v35, %v1554_v12  ;;  %v1457_v32 = vmul.f32 %v1153_v27, %v4498_v16  ;;  %v1644_v45 = vpack.c.bf16 %v1564_v4, %v1556_v22  ;;  %v1141_v47 = vrot.slane %v4211_v26, %v5058_v24 }
 0x155   : > { %v1149_v20 = vrot.slane %v4211_v26, %v5059_v19  ;;  %v1177_v39 = vrot.slane %v4221_v10, %v4183_v1  ;;  %v1591_v30 = vpack.c.bf16 %v1455_v42, %v1447_v23  ;;  %v1185_v33 = vrot.slane %v4221_v10, %v4186_v5 }
 0x156   : > { %1713 = vmatpush1.bf16.msra.mxu0 %v1642_v41  ;;  %v1593_v52 = vpack.c.bf16 %v1457_v32, %v1449_v44  ;;  %v1173_v3 = vrot.slane %v4221_v10, %v5058_v24  ;;  %1826 = vmatpush1.bf16.msra.mxu1 %v1644_v45  ;;  %v1446_v43 = vmul.f32 %v1141_v47, %v5060_v56 }
 0x157   : > { %v1454_v38 = vmul.f32 %v1141_v47, %v4457_v37  ;;  %v1448_v34 = vmul.f32 %v1149_v20, %v5061_v58  ;;  %v1456_v26 = vmul.f32 %v1149_v20, %v4517_v13  ;;  %1924 = vmatprep.subr.bf16.mxu0 %v1591_v30  ;;  %v1463_v17 = vmul.f32 %v1177_v39, %v5056_v36 }
 0x158   : > { %2037 = vmatprep.subr.bf16.mxu1 %v1593_v52  ;;  %v1471_v21 = vmul.f32 %v1177_v39, %v4471_v48  ;;  %v1465_v18 = vmul.f32 %v1185_v33, %v5057_v63  ;;  %v1473_v27 = vmul.f32 %v1185_v33, %v4498_v16  ;;  %v1462_v22 = vmul.f32 %v1173_v3, %v5060_v56 }
 0x159   : > { %1731 = vmatmul.mubr.bf16.vlgmr.msra.gmra.mrb[0].mxu0 %v4525_v40  ;;  %v1590_v12 = vpack.c.bf16 %v1454_v38, %v1446_v43  ;;  %v1592_v35 = vpack.c.bf16 %v1456_v26, %v1448_v34  ;;  %1844 = vmatmul.mubr.bf16.vlgmr.msra.gmra.mrb[0].mxu1 %v4525_v40  ;;  %v1470_v23 = vmul.f32 %v1173_v3, %v4457_v37  ;;  %v5062_v3 = vmov 0   ;;  %v4565_v38 = vld [vmem:[#allocation7 + $0x8] sm:$0xff]  }
 0x15a   : > { %v1599_v4 = vpack.c.bf16 %v1471_v21, %v1463_v17  ;;  %v1181_v41 = vrot.slane %v4221_v10, %v5059_v19  ;;  %v1209_v42 = vrot.slane %v4215_v49, %v4183_v1  ;;  %v1601_v44 = vpack.c.bf16 %v1473_v27, %v1465_v18  ;;  %1740 = vmatprep.mubr.bf16.mxu0 %v5062_v3 }
 0x15b   : > { %1925 = vmatpush1.bf16.msra.mxu0 %v1590_v12  ;;  %2038 = vmatpush1.bf16.msra.mxu1 %v1592_v35  ;;  %v1217_v32 = vrot.slane %v4215_v49, %v4186_v5  ;;  %v1205_v45 = vrot.slane %v4215_v49, %v5058_v24  ;;  %v1598_v47 = vpack.c.bf16 %v1470_v23, %v1462_v22 }
 0x15c   : > { %1926 = vmatprep.subr.bf16.mxu0 %v1599_v4  ;;  %v1464_v20 = vmul.f32 %v1181_v41, %v5061_v58  ;;  %v1472_v39 = vmul.f32 %v1181_v41, %v4517_v13  ;;  %v1479_v10 = vmul.f32 %v1209_v42, %v5056_v36  ;;  %2039 = vmatprep.subr.bf16.mxu1 %v1601_v44 }
 0x15d   : > { %v1487_v30 = vmul.f32 %v1209_v42, %v4471_v48  ;;  %v1481_v52 = vmul.f32 %v1217_v32, %v5057_v63  ;;  %v1489_v33 = vmul.f32 %v1217_v32, %v4498_v16  ;;  %1853 = vmatprep.mubr.bf16.mxu1 %v5062_v3  ;;  %v1478_v34 = vmul.f32 %v1205_v45, %v5060_v56 }
 0x15e   : > { %v1600_v43 = vpack.c.bf16 %v1472_v39, %v1464_v20  ;;  %v1486_v26 = vmul.f32 %v1205_v45, %v4457_v37  ;;  %v1213_v17 = vrot.slane %v4215_v49, %v5059_v19  ;;  %v1241_v12 = vrot.slane %v4223_v0, %v4183_v1 }
 0x15f   : > { %1927 = vmatpush1.bf16.msra.mxu0 %v1598_v47  ;;  %v1607_v21 = vpack.c.bf16 %v1487_v30, %v1479_v10  ;;  %v1609_v18 = vpack.c.bf16 %v1489_v33, %v1481_v52  ;;  %v1249_v35 = vrot.slane %v4223_v0, %v4186_v5  ;;  %v1237_v23 = vrot.slane %v4223_v0, %v5058_v24 }
 0x160   : > { %2040 = vmatpush1.bf16.msra.mxu1 %v1600_v43  ;;  %v1606_v27 = vpack.c.bf16 %v1486_v26, %v1478_v34  ;;  %v1480_v22 = vmul.f32 %v1213_v17, %v5061_v58  ;;  %v1488_v4 = vmul.f32 %v1213_v17, %v4517_v13  ;;  %v1495_v49 = vmul.f32 %v1241_v12, %v5056_v36 }
 0x161   : > { %1928 = vmatprep.subr.bf16.mxu0 %v1607_v21  ;;  %2041 = vmatprep.subr.bf16.mxu1 %v1609_v18  ;;  %v1503_v41 = vmul.f32 %v1241_v12, %v4471_v48  ;;  %v1497_v42 = vmul.f32 %v1249_v35, %v5057_v63  ;;  %v1505_v32 = vmul.f32 %v1249_v35, %v4498_v16  ;;  %v4603_v35 = vld [vmem:[#allocation7 + $0x10] sm:$0xff]  }
 0x162   : > { %1741 = vmatmul.mubr.bf16.gmra.mrb[4].mxu0 %v4565_v38  ;;  %1854 = vmatmul.mubr.bf16.gmra.mrb[4].mxu1 %v4565_v38  ;;  %v1608_v44 = vpack.c.bf16 %v1488_v4, %v1480_v22  ;;  %v1494_v45 = vmul.f32 %v1237_v23, %v5060_v56  ;;  %v1502_v20 = vmul.f32 %v1237_v23, %v4457_v37 }
 0x163   : > { %1929 = vmatpush1.bf16.msra.mxu0 %v1606_v27  ;;  %v1615_v47 = vpack.c.bf16 %v1503_v41, %v1495_v49  ;;  %v1245_v39 = vrot.slane %v4223_v0, %v5059_v19  ;;  %v1273_v10 = vrot.slane %v4217_v57, %v4183_v1  ;;  %v1617_v30 = vpack.c.bf16 %v1505_v32, %v1497_v42 }
 0x164   : > { %2042 = vmatpush1.bf16.msra.mxu1 %v1608_v44  ;;  %v1281_v52 = vrot.slane %v4217_v57, %v4186_v5  ;;  %1750 = vmatprep.mubr.bf16.mxu0 %v5062_v3  ;;  %v1269_v33 = vrot.slane %v4217_v57, %v5058_v24  ;;  %v1614_v43 = vpack.c.bf16 %v1502_v20, %v1494_v45 }
 0x165   : > { %1930 = vmatprep.subr.bf16.mxu0 %v1615_v47  ;;  %v1496_v34 = vmul.f32 %v1245_v39, %v5061_v58  ;;  %v1504_v26 = vmul.f32 %v1245_v39, %v4517_v13  ;;  %v1511_v0 = vmul.f32 %v1273_v10, %v5056_v36  ;;  %2043 = vmatprep.subr.bf16.mxu1 %v1617_v30 }
 0x166   : > { %v1519_v17 = vmul.f32 %v1273_v10, %v4471_v48  ;;  %v1513_v21 = vmul.f32 %v1281_v52, %v5057_v63  ;;  %v1521_v18 = vmul.f32 %v1281_v52, %v4498_v16  ;;  %1863 = vmatprep.mubr.bf16.mxu1 %v5062_v3  ;;  %v1510_v27 = vmul.f32 %v1269_v33, %v5060_v56 }
 0x167   : > { %1931 = vmatpush1.bf16.msra.mxu0 %v1614_v43  ;;  %v1616_v12 = vpack.c.bf16 %v1504_v26, %v1496_v34  ;;  %v1518_v22 = vmul.f32 %v1269_v33, %v4457_v37  ;;  %v1277_v4 = vrot.slane %v4217_v57, %v5059_v19  ;;  %v1305_v41 = vrot.slane %v4225_v11, %v4183_v1 }
 0x168   : > { %v1623_v23 = vpack.c.bf16 %v1519_v17, %v1511_v0  ;;  %v1625_v49 = vpack.c.bf16 %v1521_v18, %v1513_v21  ;;  %v1313_v42 = vrot.slane %v4225_v11, %v4186_v5  ;;  %v1301_v47 = vrot.slane %v4225_v11, %v5058_v24 }
 0x169   : > { %2044 = vmatpush1.bf16.msra.mxu1 %v1616_v12  ;;  %v1622_v44 = vpack.c.bf16 %v1518_v22, %v1510_v27  ;;  %v1512_v32 = vmul.f32 %v1277_v4, %v5061_v58  ;;  %v1520_v45 = vmul.f32 %v1277_v4, %v4517_v13  ;;  %v1527_v57 = vmul.f32 %v1305_v41, %v5056_v36 }
 0x16a   : > { %1932 = vmatprep.subr.bf16.mxu0 %v1623_v23  ;;  %2045 = vmatprep.subr.bf16.mxu1 %v1625_v49  ;;  %v1535_v20 = vmul.f32 %v1305_v41, %v4471_v48  ;;  %v1529_v39 = vmul.f32 %v1313_v42, %v5057_v63  ;;  %v1537_v30 = vmul.f32 %v1313_v42, %v4498_v16  ;;  %v4641_v41 = vld [vmem:[#allocation7 + $0x18] sm:$0xff]  }
 0x16b   : > { %1751 = vmatmul.mubr.bf16.gmra.mrb[8].mxu0 %v4603_v35  ;;  %1864 = vmatmul.mubr.bf16.gmra.mrb[8].mxu1 %v4603_v35  ;;  %v1624_v10 = vpack.c.bf16 %v1520_v45, %v1512_v32  ;;  %v1526_v52 = vmul.f32 %v1301_v47, %v5060_v56  ;;  %v1534_v43 = vmul.f32 %v1301_v47, %v4457_v37 }
 0x16c   : > { %1933 = vmatpush1.bf16.msra.mxu0 %v1622_v44  ;;  %v1631_v33 = vpack.c.bf16 %v1535_v20, %v1527_v57  ;;  %v1309_v34 = vrot.slane %v4225_v11, %v5059_v19  ;;  %v1337_v26 = vrot.slane %v4219_v60, %v4183_v1  ;;  %v1633_v0 = vpack.c.bf16 %v1537_v30, %v1529_v39 }
 0x16d   : > { %2046 = vmatpush1.bf16.msra.mxu1 %v1624_v10  ;;  %v1345_v17 = vrot.slane %v4219_v60, %v4186_v5  ;;  %1760 = vmatprep.mubr.bf16.mxu0 %v5062_v3  ;;  %v1333_v21 = vrot.slane %v4219_v60, %v5058_v24  ;;  %v1630_v18 = vpack.c.bf16 %v1534_v43, %v1526_v52 }
 0x16e   : > { %1934 = vmatprep.subr.bf16.mxu0 %v1631_v33  ;;  %v1528_v12 = vmul.f32 %v1309_v34, %v5061_v58  ;;  %v1536_v27 = vmul.f32 %v1309_v34, %v4517_v13  ;;  %v1543_v11 = vmul.f32 %v1337_v26, %v5056_v36  ;;  %2047 = vmatprep.subr.bf16.mxu1 %v1633_v0 }
 0x16f   : > { %v1551_v22 = vmul.f32 %v1337_v26, %v4471_v48  ;;  %v1545_v4 = vmul.f32 %v1345_v17, %v5057_v63  ;;  %v1553_v23 = vmul.f32 %v1345_v17, %v4498_v16  ;;  %1873 = vmatprep.mubr.bf16.mxu1 %v5062_v3  ;;  %v1542_v42 = vmul.f32 %v1333_v21, %v5060_v56 }
 0x170   : > { %1935 = vmatpush1.bf16.msra.mxu0 %v1630_v18  ;;  %v1632_v49 = vpack.c.bf16 %v1536_v27, %v1528_v12  ;;  %v1550_v44 = vmul.f32 %v1333_v21, %v4457_v37  ;;  %v1341_v32 = vrot.slane %v4219_v60, %v5059_v19  ;;  %v1369_v57 = vrot.slane %v4229_v6, %v4183_v1 }
 0x171   : > { %v1639_v45 = vpack.c.bf16 %v1551_v22, %v1543_v11  ;;  %v1641_v47 = vpack.c.bf16 %v1553_v23, %v1545_v4  ;;  %v1377_v20 = vrot.slane %v4229_v6, %v4186_v5  ;;  %v1365_v52 = vrot.slane %v4229_v6, %v5058_v24 }
 0x172   : > { %2048 = vmatpush1.bf16.msra.mxu1 %v1632_v49  ;;  %v1638_v39 = vpack.c.bf16 %v1550_v44, %v1542_v42  ;;  %v1544_v10 = vmul.f32 %v1341_v32, %v5061_v58  ;;  %v1552_v30 = vmul.f32 %v1341_v32, %v4517_v13  ;;  %v1559_v60 = vmul.f32 %v1369_v57, %v5056_v36 }
 0x173   : > { %1936 = vmatprep.subr.bf16.mxu0 %v1639_v45  ;;  %2049 = vmatprep.subr.bf16.mxu1 %v1641_v47  ;;  %v1567_v33 = vmul.f32 %v1369_v57, %v4471_v48  ;;  %v1561_v43 = vmul.f32 %v1377_v20, %v5057_v63  ;;  %v1569_v26 = vmul.f32 %v1377_v20, %v4498_v16 }
 0x174   : > { %1761 = vmatmul.mubr.bf16.gmra.mrb[12].mxu0 %v4641_v41  ;;  %1874 = vmatmul.mubr.bf16.gmra.mrb[12].mxu1 %v4641_v41  ;;  %v1640_v34 = vpack.c.bf16 %v1552_v30, %v1544_v10  ;;  %v1558_v0 = vmul.f32 %v1365_v52, %v5060_v56  ;;  %v1566_v21 = vmul.f32 %v1365_v52, %v4457_v37  ;;  %v3587_v56 = vld [vmem:[#allocation7 + $0x20] sm:$0xff]   ;;  %v3589_v37 = vld [vmem:[#allocation7 + $0x30] sm:$0xff]  }
 0x175   : > { %1937 = vmatpush1.bf16.msra.mxu0 %v1638_v39  ;;  %v1647_v17 = vpack.c.bf16 %v1567_v33, %v1559_v60  ;;  %v1373_v36 = vrot.slane %v4229_v6, %v5059_v19  ;;  %1770 = vmatprep.mubr.bf16.mxu0 %v5062_v3  ;;  %v1649_v48 = vpack.c.bf16 %v1569_v26, %v1561_v43  ;;  %v3588_v6 = vld [vmem:[#allocation7 + $0x28] sm:$0xff]  }
 0x176   : > { %2050 = vmatpush1.bf16.msra.mxu1 %v1640_v34  ;;  %1883 = vmatprep.mubr.bf16.mxu1 %v5062_v3  ;;  %v1646_v63 = vpack.c.bf16 %v1566_v21, %v1558_v0  ;;  %v2453_v4 = vrot.slane %v4364_v9, %v4177_v61  ;;  %v2481_v44 = vrot.slane %v4372_v15, %v4180_v62 }
 0x177   : > { %1938 = vmatprep.subr.bf16.mxu0 %v1647_v17  ;;  %v1560_v18 = vmul.f32 %v1373_v36, %v5061_v58  ;;  %v1568_v16 = vmul.f32 %v1373_v36, %v4517_v13  ;;  %2051 = vmatprep.subr.bf16.mxu1 %v1649_v48  ;;  %v3590_v13 = vld [vmem:[#allocation7 + $0x38] sm:$0xff]   ;;  %v2477_v32 = vrot.slane %v4372_v15, %v4160_v55 }
 0x178   : > { %v2485_v39 = vrot.slane %v4372_v15, %v4177_v61  ;;  %v2505_v0 = vrot.slane %v4366_v46, %v4068_v29  ;;  %v2513_v17 = vrot.slane %v4366_v46, %v4180_v62  ;;  %v2509_v48 = vrot.slane %v4366_v46, %v4160_v55 }
 0x179   : > { %1939 = vmatpush1.bf16.msra.mxu0 %v1646_v63  ;;  %v1648_v12 = vpack.c.bf16 %v1568_v16, %v1560_v18  ;;  %v2517_v63 = vrot.slane %v4366_v46, %v4177_v61 }
 0x17b   : > { %2052 = vmatpush1.bf16.msra.mxu1 %v1648_v12 }
 0x17c   : > { %1771 = vmatmul.mubr.bf16.gmra.mrb[16].mxu0 %v3587_v56  ;;  %1884 = vmatmul.mubr.bf16.gmra.mrb[16].mxu1 %v3587_v56 }
 0x17d   : > { %1780 = vmatprep.mubr.bf16.mxu0 %v5062_v3  ;;  %1893 = vmatprep.mubr.bf16.mxu1 %v5062_v3 }
 0x184   : > { %1781 = vmatmul.mubr.bf16.gmra.mrb[20].mxu0 %v3588_v6  ;;  %1894 = vmatmul.mubr.bf16.gmra.mrb[20].mxu1 %v3588_v6 }
 0x185   : > { %1790 = vmatprep.mubr.bf16.mxu0 %v5062_v3  ;;  %1903 = vmatprep.mubr.bf16.mxu1 %v5062_v3 }
 0x18c   : > { %1791 = vmatmul.mubr.bf16.gmra.mrb[24].mxu0 %v3589_v37  ;;  %1904 = vmatmul.mubr.bf16.gmra.mrb[24].mxu1 %v3589_v37 }
 0x18d   : > { %1800 = vmatprep.mubr.bf16.mxu0 %v5062_v3  ;;  %1913 = vmatprep.mubr.bf16.mxu1 %v5062_v3 }
 0x194   : > { %1801 = vmatmul.mubr.bf16.gmra.mrb[28].mxu0 %v3590_v13  ;;  %1914 = vmatmul.mubr.bf16.gmra.mrb[28].mxu1 %v3590_v13 }
 0x195   : > { %1956 = vmatprep.mubr.bf16.mxu0 %v5062_v3  ;;  %2069 = vmatprep.mubr.bf16.mxu1 %v5062_v3 }
 0x19c   : > { %1957 = vmatmul.mubr.bf16.vlgmr.msra.gmra.mrb[32].mxu0 %v4525_v40  ;;  %2070 = vmatmul.mubr.bf16.vlgmr.msra.gmra.mrb[32].mxu1 %v4525_v40  ;;  %v2441_v40 = vrot.slane %v4364_v9, %v4068_v29 }
 0x19d   : > { %1966 = vmatprep.mubr.bf16.mxu0 %v5062_v3  ;;  %2079 = vmatprep.mubr.bf16.mxu1 %v5062_v3 }
 0x1a4   : > { %1967 = vmatmul.mubr.bf16.gmra.mrb[36].mxu0 %v4565_v38  ;;  %2080 = vmatmul.mubr.bf16.gmra.mrb[36].mxu1 %v4565_v38  ;;  %v2449_v38 = vrot.slane %v4364_v9, %v4180_v62 }
 0x1a5   : > { %1976 = vmatprep.mubr.bf16.mxu0 %v5062_v3  ;;  %2089 = vmatprep.mubr.bf16.mxu1 %v5062_v3 }
 0x1ac   : > { %1977 = vmatmul.mubr.bf16.gmra.mrb[40].mxu0 %v4603_v35  ;;  %2090 = vmatmul.mubr.bf16.gmra.mrb[40].mxu1 %v4603_v35  ;;  %v2445_v35 = vrot.slane %v4364_v9, %v4160_v55 }
 0x1ad   : > { %1986 = vmatprep.mubr.bf16.mxu0 %v5062_v3  ;;  %2099 = vmatprep.mubr.bf16.mxu1 %v5062_v3 }
 0x1b4   : > { %1987 = vmatmul.mubr.bf16.gmra.mrb[44].mxu0 %v4641_v41  ;;  %2100 = vmatmul.mubr.bf16.gmra.mrb[44].mxu1 %v4641_v41 }
 0x1b5   : > { %1996 = vmatprep.mubr.bf16.mxu0 %v5062_v3  ;;  %2109 = vmatprep.mubr.bf16.mxu1 %v5062_v3 }
 0x1bc   : > { %1997 = vmatmul.mubr.bf16.gmra.mrb[48].mxu0 %v3587_v56  ;;  %2110 = vmatmul.mubr.bf16.gmra.mrb[48].mxu1 %v3587_v56 }
 0x1bd   : > { %2006 = vmatprep.mubr.bf16.mxu0 %v5062_v3  ;;  %2119 = vmatprep.mubr.bf16.mxu1 %v5062_v3 }
 0x1c4   : > { %2007 = vmatmul.mubr.bf16.gmra.mrb[52].mxu0 %v3588_v6  ;;  %2120 = vmatmul.mubr.bf16.gmra.mrb[52].mxu1 %v3588_v6  ;;  %v2537_v6 = vrot.slane %v4374_v51, %v4068_v29 }
 0x1c5   : > { %2016 = vmatprep.mubr.bf16.mxu0 %v5062_v3  ;;  %2129 = vmatprep.mubr.bf16.mxu1 %v5062_v3 }
 0x1cc   : > { %2017 = vmatmul.mubr.bf16.gmra.mrb[56].mxu0 %v3589_v37  ;;  %2130 = vmatmul.mubr.bf16.gmra.mrb[56].mxu1 %v3589_v37  ;;  %v2545_v37 = vrot.slane %v4374_v51, %v4180_v62 }
 0x1cd   : > { %2026 = vmatprep.mubr.bf16.mxu0 %v5062_v3  ;;  %2139 = vmatprep.mubr.bf16.mxu1 %v5062_v3  ;;  %v2473_v3 = vrot.slane %v4372_v15, %v4068_v29 }
 0x1d4   : > { %2027 = vmatmul.mubr.bf16.gmra.mrb[60].mxu0 %v3590_v13  ;;  %2140 = vmatmul.mubr.bf16.gmra.mrb[60].mxu1 %v3590_v13 }
 0x22c   : > { %v1732_v58 = vpop.f32.mrb[0].mxu0  ;;  %v1845_v11 = vpop.f32.mrb[0].mxu1 }
 0x22d   : > { %v3078_v27 = vmul.f32 %v2441_v40, %v1732_v58  ;;  %v1734_v22 = vpop.f32.mrb[1].mxu0  ;;  %v3080_v23 = vmul.f32 %v2449_v38, %v1845_v11  ;;  %v1847_v41 = vpop.f32.mrb[1].mxu1 }
 0x22e   : > { %v3079_v49 = vmul.f32 %v2445_v35, %v1734_v22  ;;  %v1736_v42 = vpop.f32.mrb[2].mxu0  ;;  %v3081_v45 = vmul.f32 %v2453_v4, %v1847_v41  ;;  %v1849_v57 = vpop.f32.mrb[2].mxu1  ;;  %v2541_v35 = vrot.slane %v4374_v51, %v4160_v55 }
 0x22f   : > { %v3086_v47 = vmul.f32 %v2473_v3, %v1736_v42  ;;  %v1738_v20 = vpop.f32.mrb[3].mxu0  ;;  %v3088_v10 = vmul.f32 %v2481_v44, %v1849_v57  ;;  %v1851_v52 = vpop.f32.mrb[3].mxu1 }
 0x230   : > { %v3087_v30 = vmul.f32 %v2477_v32, %v1738_v20  ;;  %v3089_v33 = vmul.f32 %v2485_v39, %v1851_v52  ;;  %v2569_v39 = vrot.slane %v4368_v7, %v4068_v29 }
 0x231   : > { %v3206_v60 = vadd.f32 %v3086_v47, %v3078_v27  ;;  %v3208_v43 = vadd.f32 %v3088_v10, %v3080_v23  ;;  %v2549_v27 = vrot.slane %v4374_v51, %v4177_v61  ;;  %v2577_v10 = vrot.slane %v4368_v7, %v4180_v62 }
 0x232   : > { %v3207_v34 = vadd.f32 %v3087_v30, %v3079_v49  ;;  %v3209_v26 = vadd.f32 %v3089_v33, %v3081_v45  ;;  %v2581_v33 = vrot.slane %v4368_v7, %v4177_v61 }
 0x235   : > { %v1742_v21 = vpop.f32.mrb[4].mxu0  ;;  %v1855_v36 = vpop.f32.mrb[4].mxu1 }
 0x236   : > { %v3094_v18 = vmul.f32 %v2505_v0, %v1742_v21  ;;  %v3096_v16 = vmul.f32 %v2513_v17, %v1855_v36  ;;  %v1744_v56 = vpop.f32.mrb[5].mxu0  ;;  %v1857_v12 = vpop.f32.mrb[5].mxu1  ;;  %v2601_v17 = vrot.slane %v4376_v50, %v4068_v29  ;;  %v2609_v21 = vrot.slane %v4376_v50, %v4180_v62 }
 0x237   : > { %v3095_v13 = vmul.f32 %v2509_v48, %v1744_v56  ;;  %v3097_v40 = vmul.f32 %v2517_v63, %v1857_v12  ;;  %v1746_v58 = vpop.f32.mrb[6].mxu0  ;;  %v1859_v38 = vpop.f32.mrb[6].mxu1  ;;  %v2613_v56 = vrot.slane %v4376_v50, %v4177_v61 }
 0x238   : > { %v3214_v11 = vadd.f32 %v3206_v60, %v3094_v18  ;;  %v3216_v22 = vadd.f32 %v3208_v43, %v3096_v16  ;;  %v3102_v4 = vmul.f32 %v2537_v6, %v1746_v58  ;;  %v3104_v3 = vmul.f32 %v2545_v37, %v1859_v38  ;;  %v1748_v23 = vpop.f32.mrb[7].mxu0  ;;  %v1861_v49 = vpop.f32.mrb[7].mxu1 }
 0x239   : > { %v3215_v41 = vadd.f32 %v3207_v34, %v3095_v13  ;;  %v3217_v42 = vadd.f32 %v3209_v26, %v3097_v40  ;;  %v3103_v44 = vmul.f32 %v2541_v35, %v1748_v23  ;;  %v3105_v32 = vmul.f32 %v2549_v27, %v1861_v49 }
 0x23a   : > { %v3222_v45 = vadd.f32 %v3214_v11, %v3102_v4  ;;  %v3224_v47 = vadd.f32 %v3216_v22, %v3104_v3  ;;  %v2573_v60 = vrot.slane %v4368_v7, %v4160_v55  ;;  %v2605_v16 = vrot.slane %v4376_v50, %v4160_v55 }
 0x23b   : > { %v3223_v57 = vadd.f32 %v3215_v41, %v3103_v44  ;;  %v3225_v20 = vadd.f32 %v3217_v42, %v3105_v32  ;;  %v2633_v49 = vrot.slane %v4370_v14, %v4068_v29  ;;  %v2641_v41 = vrot.slane %v4370_v14, %v4180_v62 }
 0x23c   : > { %v2637_v32 = vrot.slane %v4370_v14, %v4160_v55 }
 0x23e   : > { %v1752_v30 = vpop.f32.mrb[8].mxu0  ;;  %v1865_v52 = vpop.f32.mrb[8].mxu1 }
 0x23f   : > { %v3110_v43 = vmul.f32 %v2569_v39, %v1752_v30  ;;  %v3112_v34 = vmul.f32 %v2577_v10, %v1865_v52  ;;  %v1754_v26 = vpop.f32.mrb[9].mxu0  ;;  %v1867_v0 = vpop.f32.mrb[9].mxu1  ;;  %v2665_v10 = vrot.slane %v4378_v8, %v4068_v29  ;;  %v2673_v30 = vrot.slane %v4378_v8, %v4180_v62 }
 0x240   : > { %v3111_v36 = vmul.f32 %v2573_v60, %v1754_v26  ;;  %v3113_v48 = vmul.f32 %v2581_v33, %v1867_v0  ;;  %v1756_v63 = vpop.f32.mrb[10].mxu0  ;;  %v1869_v18 = vpop.f32.mrb[10].mxu1  ;;  %v2677_v26 = vrot.slane %v4378_v8, %v4177_v61 }
 0x241   : > { %v3230_v12 = vadd.f32 %v3222_v45, %v3110_v43  ;;  %v3232_v6 = vadd.f32 %v3224_v47, %v3112_v34  ;;  %v3118_v37 = vmul.f32 %v2601_v17, %v1756_v63  ;;  %v3120_v13 = vmul.f32 %v2609_v21, %v1869_v18  ;;  %v1758_v40 = vpop.f32.mrb[11].mxu0  ;;  %v1871_v58 = vpop.f32.mrb[11].mxu1 }
 0x242   : > { %v3231_v38 = vadd.f32 %v3223_v57, %v3111_v36  ;;  %v3233_v35 = vadd.f32 %v3225_v20, %v3113_v48  ;;  %v3119_v27 = vmul.f32 %v2605_v16, %v1758_v40  ;;  %v3121_v11 = vmul.f32 %v2613_v56, %v1871_v58 }
 0x243   : > { %v3238_v22 = vadd.f32 %v3230_v12, %v3118_v37  ;;  %v3240_v4 = vadd.f32 %v3232_v6, %v3120_v13  ;;  %v2645_v45 = vrot.slane %v4370_v14, %v4177_v61  ;;  %v2669_v34 = vrot.slane %v4378_v8, %v4160_v55 }
 0x244   : > { %v3239_v3 = vadd.f32 %v3231_v38, %v3119_v27  ;;  %v3241_v23 = vadd.f32 %v3233_v35, %v3121_v11  ;;  %v2697_v58 = vrot.slane %v4316_v25, %v4068_v29  ;;  %v2705_v38 = vrot.slane %v4316_v25, %v4180_v62 }
 0x245   : > { %v2701_v11 = vrot.slane %v4316_v25, %v4160_v55 }
 0x247   : > { %v1762_v42 = vpop.f32.mrb[12].mxu0  ;;  %v1875_v44 = vpop.f32.mrb[12].mxu1 }
 0x248   : > { %v3126_v47 = vmul.f32 %v2633_v49, %v1762_v42  ;;  %v3128_v57 = vmul.f32 %v2641_v41, %v1875_v44  ;;  %v1764_v20 = vpop.f32.mrb[13].mxu0  ;;  %v1877_v39 = vpop.f32.mrb[13].mxu1  ;;  %v2729_v41 = vrot.slane %v4324_v31, %v4068_v29  ;;  %v2737_v42 = vrot.slane %v4324_v31, %v4180_v62 }
 0x249   : > { %v3127_v52 = vmul.f32 %v2637_v32, %v1764_v20  ;;  %v3129_v60 = vmul.f32 %v2645_v45, %v1877_v39  ;;  %v1766_v33 = vpop.f32.mrb[14].mxu0  ;;  %v1879_v43 = vpop.f32.mrb[14].mxu1  ;;  %v2741_v20 = vrot.slane %v4324_v31, %v4177_v61 }
 0x24a   : > { %v3246_v0 = vadd.f32 %v3238_v22, %v3126_v47  ;;  %v3248_v17 = vadd.f32 %v3240_v4, %v3128_v57  ;;  %v3134_v21 = vmul.f32 %v2665_v10, %v1766_v33  ;;  %v3136_v36 = vmul.f32 %v2673_v30, %v1879_v43  ;;  %v1768_v48 = vpop.f32.mrb[15].mxu0  ;;  %v1881_v63 = vpop.f32.mrb[15].mxu1 }
 0x24b   : > { %v3247_v18 = vadd.f32 %v3239_v3, %v3127_v52  ;;  %v3249_v16 = vadd.f32 %v3241_v23, %v3129_v60  ;;  %v3135_v56 = vmul.f32 %v2669_v34, %v1768_v48  ;;  %v3137_v12 = vmul.f32 %v2677_v26, %v1881_v63 }
 0x24c   : > { %v3254_v6 = vadd.f32 %v3246_v0, %v3134_v21  ;;  %v3256_v37 = vadd.f32 %v3248_v17, %v3136_v36  ;;  %v2709_v22 = vrot.slane %v4316_v25, %v4177_v61  ;;  %v2733_v57 = vrot.slane %v4324_v31, %v4160_v55 }
 0x24d   : > { %v3255_v13 = vadd.f32 %v3247_v18, %v3135_v56  ;;  %v3257_v40 = vadd.f32 %v3249_v16, %v3137_v12  ;;  %v2761_v63 = vrot.slane %v4318_v28, %v4068_v29  ;;  %v2769_v18 = vrot.slane %v4318_v28, %v4180_v62 }
 0x24e   : > { %v2765_v12 = vrot.slane %v4318_v28, %v4160_v55 }
 0x24f   : > { %v1772_v35 = vpop.f32.mrb[16].mxu0  ;;  %v1885_v27 = vpop.f32.mrb[16].mxu1 }
 0x250   : > { %v3142_v4 = vmul.f32 %v2697_v58, %v1772_v35  ;;  %v3144_v3 = vmul.f32 %v2705_v38, %v1885_v27  ;;  %v1774_v23 = vpop.f32.mrb[17].mxu0  ;;  %v1887_v49 = vpop.f32.mrb[17].mxu1  ;;  %v2793_v38 = vrot.slane %v4326_v54, %v4068_v29  ;;  %v2801_v35 = vrot.slane %v4326_v54, %v4180_v62 }
 0x251   : > { %v3143_v44 = vmul.f32 %v2701_v11, %v1774_v23  ;;  %v3145_v32 = vmul.f32 %v2709_v22, %v1887_v49  ;;  %v1776_v45 = vpop.f32.mrb[18].mxu0  ;;  %v1889_v47 = vpop.f32.mrb[18].mxu1  ;;  %v2805_v23 = vrot.slane %v4326_v54, %v4177_v61 }
 0x252   : > { %v3262_v39 = vadd.f32 %v3254_v6, %v3142_v4  ;;  %v3264_v10 = vadd.f32 %v3256_v37, %v3144_v3  ;;  %v3150_v30 = vmul.f32 %v2729_v41, %v1776_v45  ;;  %v3152_v52 = vmul.f32 %v2737_v42, %v1889_v47  ;;  %v1778_v60 = vpop.f32.mrb[19].mxu0  ;;  %v1891_v33 = vpop.f32.mrb[19].mxu1 }
 0x253   : > { %v3263_v43 = vadd.f32 %v3255_v13, %v3143_v44  ;;  %v3265_v34 = vadd.f32 %v3257_v40, %v3145_v32  ;;  %v3151_v26 = vmul.f32 %v2733_v57, %v1778_v60  ;;  %v3153_v0 = vmul.f32 %v2741_v20, %v1891_v33 }
 0x254   : > { %v3270_v17 = vadd.f32 %v3262_v39, %v3150_v30  ;;  %v3272_v21 = vadd.f32 %v3264_v10, %v3152_v52  ;;  %v2773_v6 = vrot.slane %v4318_v28, %v4177_v61  ;;  %v2797_v3 = vrot.slane %v4326_v54, %v4160_v55 }
 0x255   : > { %v3271_v36 = vadd.f32 %v3263_v43, %v3151_v26  ;;  %v3273_v48 = vadd.f32 %v3265_v34, %v3153_v0  ;;  %v2825_v33 = vrot.slane %v4320_v2, %v4068_v29  ;;  %v2833_v43 = vrot.slane %v4320_v2, %v4180_v62 }
 0x256   : > { %v2829_v0 = vrot.slane %v4320_v2, %v4160_v55 }
 0x257   : > { %v1782_v16 = vpop.f32.mrb[20].mxu0  ;;  %v1895_v56 = vpop.f32.mrb[20].mxu1 }
 0x258   : > { %v3158_v37 = vmul.f32 %v2761_v63, %v1782_v16  ;;  %v3160_v13 = vmul.f32 %v2769_v18, %v1895_v56  ;;  %v1784_v40 = vpop.f32.mrb[21].mxu0  ;;  %v1897_v58 = vpop.f32.mrb[21].mxu1  ;;  %v2857_v18 = vrot.slane %v4328_v59, %v4068_v29  ;;  %v2865_v16 = vrot.slane %v4328_v59, %v4180_v62 }
 0x259   : > { %v3159_v27 = vmul.f32 %v2765_v12, %v1784_v40  ;;  %v3161_v11 = vmul.f32 %v2773_v6, %v1897_v58  ;;  %v1786_v22 = vpop.f32.mrb[22].mxu0  ;;  %v1899_v4 = vpop.f32.mrb[22].mxu1  ;;  %v2869_v40 = vrot.slane %v4328_v59, %v4177_v61 }
 0x25a   : > { %v3278_v49 = vadd.f32 %v3270_v17, %v3158_v37  ;;  %v3280_v41 = vadd.f32 %v3272_v21, %v3160_v13  ;;  %v3166_v42 = vmul.f32 %v2793_v38, %v1786_v22  ;;  %v3168_v44 = vmul.f32 %v2801_v35, %v1899_v4  ;;  %v1788_v32 = vpop.f32.mrb[23].mxu0  ;;  %v1901_v45 = vpop.f32.mrb[23].mxu1 }
 0x25b   : > { %v3279_v47 = vadd.f32 %v3271_v36, %v3159_v27  ;;  %v3281_v57 = vadd.f32 %v3273_v48, %v3161_v11  ;;  %v3167_v20 = vmul.f32 %v2797_v3, %v1788_v32  ;;  %v3169_v39 = vmul.f32 %v2805_v23, %v1901_v45 }
 0x25c   : > { %v3286_v10 = vadd.f32 %v3278_v49, %v3166_v42  ;;  %v3288_v30 = vadd.f32 %v3280_v41, %v3168_v44  ;;  %v2837_v17 = vrot.slane %v4320_v2, %v4177_v61  ;;  %v2861_v13 = vrot.slane %v4328_v59, %v4160_v55 }
 0x25d   : > { %v3287_v52 = vadd.f32 %v3279_v47, %v3167_v20  ;;  %v3289_v60 = vadd.f32 %v3281_v57, %v3169_v39  ;;  %v2889_v45 = vrot.slane %v4322_v53, %v4068_v29  ;;  %v2897_v47 = vrot.slane %v4322_v53, %v4180_v62 }
 0x25e   : > { %v2893_v39 = vrot.slane %v4322_v53, %v4160_v55 }
 0x25f   : > { %v1792_v34 = vpop.f32.mrb[24].mxu0  ;;  %v1905_v26 = vpop.f32.mrb[24].mxu1 }
 0x260   : > { %v3174_v21 = vmul.f32 %v2825_v33, %v1792_v34  ;;  %v3176_v36 = vmul.f32 %v2833_v43, %v1905_v26  ;;  %v1794_v48 = vpop.f32.mrb[25].mxu0  ;;  %v1907_v63 = vpop.f32.mrb[25].mxu1  ;;  %v5063_v43 = vld [vmem:[#allocation20_spill] sm:$0xff] }
 0x261   : > { %v3175_v56 = vmul.f32 %v2829_v0, %v1794_v48  ;;  %v3177_v12 = vmul.f32 %v2837_v17, %v1907_v63  ;;  %v1796_v6 = vpop.f32.mrb[26].mxu0  ;;  %v1909_v37 = vpop.f32.mrb[26].mxu1  ;;  %v2921_v34 = vrot.slane %v5063_v43, %v4068_v29  ;;  %v2929_v26 = vrot.slane %v5063_v43, %v4180_v62 }
 0x262   : > { %v3294_v58 = vadd.f32 %v3286_v10, %v3174_v21  ;;  %v3296_v38 = vadd.f32 %v3288_v30, %v3176_v36  ;;  %v3182_v35 = vmul.f32 %v2857_v18, %v1796_v6  ;;  %v3184_v27 = vmul.f32 %v2865_v16, %v1909_v37  ;;  %v1798_v11 = vpop.f32.mrb[27].mxu0  ;;  %v1911_v22 = vpop.f32.mrb[27].mxu1 }
 0x263   : > { %v3295_v4 = vadd.f32 %v3287_v52, %v3175_v56  ;;  %v3297_v3 = vadd.f32 %v3289_v60, %v3177_v12  ;;  %v3183_v23 = vmul.f32 %v2861_v13, %v1798_v11  ;;  %v3185_v49 = vmul.f32 %v2869_v40, %v1911_v22 }
 0x264   : > { %v3302_v41 = vadd.f32 %v3294_v58, %v3182_v35  ;;  %v3304_v42 = vadd.f32 %v3296_v38, %v3184_v27  ;;  %v2901_v10 = vrot.slane %v4322_v53, %v4177_v61  ;;  %v2925_v48 = vrot.slane %v5063_v43, %v4160_v55 }
 0x265   : > { %v3303_v44 = vadd.f32 %v3295_v4, %v3183_v23  ;;  %v3305_v32 = vadd.f32 %v3297_v3, %v3185_v49  ;;  %v2933_v63 = vrot.slane %v5063_v43, %v4177_v61  ;;  %v2457_v55 = vrot.slane %v4364_v9, %v5058_v24 }
 0x266   : > { %v2465_v61 = vrot.slane %v4364_v9, %v5059_v19  ;;  %v2461_v4 = vrot.slane %v4364_v9, %v4183_v1  ;;  %v2469_v3 = vrot.slane %v4364_v9, %v4186_v5  ;;  %v2501_v9 = vrot.slane %v4372_v15, %v4186_v5 }
 0x267   : > { %v1802_v57 = vpop.f32.mrb[28].mxu0  ;;  %v1915_v20 = vpop.f32.mrb[28].mxu1 }
 0x268   : > { %v3190_v30 = vmul.f32 %v2889_v45, %v1802_v57  ;;  %v3192_v52 = vmul.f32 %v2897_v47, %v1915_v20  ;;  %v1804_v60 = vpop.f32.mrb[29].mxu0  ;;  %v1917_v33 = vpop.f32.mrb[29].mxu1 }
 0x269   : > { %v3191_v0 = vmul.f32 %v2893_v39, %v1804_v60  ;;  %v3193_v17 = vmul.f32 %v2901_v10, %v1917_v33  ;;  %v1806_v21 = vpop.f32.mrb[30].mxu0  ;;  %v1919_v36 = vpop.f32.mrb[30].mxu1  ;;  %v2493_v39 = vrot.slane %v4372_v15, %v4183_v1 }
 0x26a   : > { %v3310_v18 = vadd.f32 %v3302_v41, %v3190_v30  ;;  %v3312_v16 = vadd.f32 %v3304_v42, %v3192_v52  ;;  %v3198_v56 = vmul.f32 %v2921_v34, %v1806_v21  ;;  %v3200_v12 = vmul.f32 %v2929_v26, %v1919_v36  ;;  %v1808_v6 = vpop.f32.mrb[31].mxu0  ;;  %v1921_v37 = vpop.f32.mrb[31].mxu1 }
 0x26b   : > { %v3311_v29 = vadd.f32 %v3303_v44, %v3191_v0  ;;  %v3313_v13 = vadd.f32 %v3305_v32, %v3193_v17  ;;  %v3199_v40 = vmul.f32 %v2925_v48, %v1808_v6  ;;  %v3201_v62 = vmul.f32 %v2933_v63, %v1921_v37 }
 0x26c   : > { %v3318_v58 = vadd.f32 %v3310_v18, %v3198_v56  ;;  %v3320_v38 = vadd.f32 %v3312_v16, %v3200_v12  ;;  %v2489_v44 = vrot.slane %v4372_v15, %v5058_v24  ;;  %v2497_v32 = vrot.slane %v4372_v15, %v5059_v19 }
 0x26d   : > { %v3319_v35 = vadd.f32 %v3311_v29, %v3199_v40  ;;  %v3321_v27 = vadd.f32 %v3313_v13, %v3201_v62  ;;  %v2521_v36 = vrot.slane %v4366_v46, %v5058_v24  ;;  %v2529_v48 = vrot.slane %v4366_v46, %v5059_v19 }
 0x26e   : > { %3326 = vst [vmem:[%s4828_s20] sm:$0xff] %v3318_v58  ;;  %3328 = vst [vmem:[%s4828_s20 + $0x10] sm:$0xff] %v3320_v38  ;;  %v2525_v15 = vrot.slane %v4366_v46, %v4183_v1  ;;  %v2533_v16 = vrot.slane %v4366_v46, %v4186_v5  ;;  %v2553_v29 = vrot.slane %v4374_v51, %v5058_v24 }
 0x26f   : > { %3327 = vst [vmem:[%s4828_s20 + $0x8] sm:$0xff] %v3319_v35  ;;  %3329 = vst [vmem:[%s4828_s20 + $0x18] sm:$0xff] %v3321_v27  ;;  %v1958_v11 = vpop.f32.mrb[32].mxu0  ;;  %v2071_v22 = vpop.f32.mrb[32].mxu1  ;;  %v2561_v13 = vrot.slane %v4374_v51, %v5059_v19  ;;  %v2557_v35 = vrot.slane %v4374_v51, %v4183_v1  ;;  %v2565_v46 = vrot.slane %v4374_v51, %v4186_v5 }
 0x270   : > { %v3082_v23 = vmul.f32 %v2457_v55, %v1958_v11  ;;  %v3084_v49 = vmul.f32 %v2465_v61, %v2071_v22  ;;  %v1960_v41 = vpop.f32.mrb[33].mxu0  ;;  %v2073_v42 = vpop.f32.mrb[33].mxu1  ;;  %v2593_v51 = vrot.slane %v4368_v7, %v5059_v19 }
 0x271   : > { %v3083_v45 = vmul.f32 %v2461_v4, %v1960_v41  ;;  %v3085_v47 = vmul.f32 %v2469_v3, %v2073_v42  ;;  %v1962_v57 = vpop.f32.mrb[34].mxu0  ;;  %v2075_v20 = vpop.f32.mrb[34].mxu1 }
 0x272   : > { %v3090_v10 = vmul.f32 %v2489_v44, %v1962_v57  ;;  %v3092_v30 = vmul.f32 %v2497_v32, %v2075_v20  ;;  %v1964_v52 = vpop.f32.mrb[35].mxu0  ;;  %v2077_v60 = vpop.f32.mrb[35].mxu1 }
 0x273   : > { %v3091_v33 = vmul.f32 %v2493_v39, %v1964_v52  ;;  %v3093_v34 = vmul.f32 %v2501_v9, %v2077_v60  ;;  %v2589_v39 = vrot.slane %v4368_v7, %v4183_v1  ;;  %v2597_v9 = vrot.slane %v4368_v7, %v4186_v5 }
 0x274   : > { %v3210_v26 = vadd.f32 %v3090_v10, %v3082_v23  ;;  %v3212_v0 = vadd.f32 %v3092_v30, %v3084_v49 }
 0x275   : > { %v3211_v17 = vadd.f32 %v3091_v33, %v3083_v45  ;;  %v3213_v21 = vadd.f32 %v3093_v34, %v3085_v47  ;;  %v2585_v47 = vrot.slane %v4368_v7, %v5058_v24  ;;  %v2617_v33 = vrot.slane %v4376_v50, %v5058_v24 }
 0x276   : > { %v2625_v34 = vrot.slane %v4376_v50, %v5059_v19  ;;  %v2629_v7 = vrot.slane %v4376_v50, %v4186_v5 }
 0x277   : > { %v1968_v63 = vpop.f32.mrb[36].mxu0  ;;  %v2081_v18 = vpop.f32.mrb[36].mxu1 }
 0x278   : > { %v3098_v56 = vmul.f32 %v2521_v36, %v1968_v63  ;;  %v3100_v12 = vmul.f32 %v2529_v48, %v2081_v18  ;;  %v1970_v6 = vpop.f32.mrb[37].mxu0  ;;  %v2083_v37 = vpop.f32.mrb[37].mxu1  ;;  %v2621_v36 = vrot.slane %v4376_v50, %v4183_v1  ;;  %v2657_v50 = vrot.slane %v4370_v14, %v5059_v19 }
 0x279   : > { %v3099_v40 = vmul.f32 %v2525_v15, %v1970_v6  ;;  %v3101_v62 = vmul.f32 %v2533_v16, %v2083_v37  ;;  %v1972_v58 = vpop.f32.mrb[38].mxu0  ;;  %v2085_v38 = vpop.f32.mrb[38].mxu1 }
 0x27a   : > { %v3218_v27 = vadd.f32 %v3210_v26, %v3098_v56  ;;  %v3220_v55 = vadd.f32 %v3212_v0, %v3100_v12  ;;  %v3106_v61 = vmul.f32 %v2553_v29, %v1972_v58  ;;  %v3108_v11 = vmul.f32 %v2561_v13, %v2085_v38  ;;  %v1974_v22 = vpop.f32.mrb[39].mxu0  ;;  %v2087_v4 = vpop.f32.mrb[39].mxu1 }
 0x27b   : > { %v3219_v3 = vadd.f32 %v3211_v17, %v3099_v40  ;;  %v3221_v23 = vadd.f32 %v3213_v21, %v3101_v62  ;;  %v3107_v49 = vmul.f32 %v2557_v35, %v1974_v22  ;;  %v3109_v41 = vmul.f32 %v2565_v46, %v2087_v4 }
 0x27c   : > { %v3226_v42 = vadd.f32 %v3218_v27, %v3106_v61  ;;  %v3228_v44 = vadd.f32 %v3220_v55, %v3108_v11  ;;  %v2649_v38 = vrot.slane %v4370_v14, %v5058_v24  ;;  %v2653_v27 = vrot.slane %v4370_v14, %v4183_v1 }
 0x27d   : > { %v3227_v32 = vadd.f32 %v3219_v3, %v3107_v49  ;;  %v3229_v45 = vadd.f32 %v3221_v23, %v3109_v41  ;;  %v2661_v55 = vrot.slane %v4370_v14, %v4186_v5  ;;  %v2681_v3 = vrot.slane %v4378_v8, %v5058_v24 }
 0x27e   : > { %v2689_v23 = vrot.slane %v4378_v8, %v5059_v19  ;;  %v2693_v14 = vrot.slane %v4378_v8, %v4186_v5 }
 0x27f   : > { %v1978_v57 = vpop.f32.mrb[40].mxu0  ;;  %v2091_v20 = vpop.f32.mrb[40].mxu1 }
 0x280   : > { %v3114_v10 = vmul.f32 %v2585_v47, %v1978_v57  ;;  %v3116_v30 = vmul.f32 %v2593_v51, %v2091_v20  ;;  %v1980_v52 = vpop.f32.mrb[41].mxu0  ;;  %v2093_v60 = vpop.f32.mrb[41].mxu1 }
 0x281   : > { %v3115_v26 = vmul.f32 %v2589_v39, %v1980_v52  ;;  %v3117_v0 = vmul.f32 %v2597_v9, %v2093_v60  ;;  %v1982_v17 = vpop.f32.mrb[42].mxu0  ;;  %v2095_v21 = vpop.f32.mrb[42].mxu1 }
 0x282   : > { %v3234_v48 = vadd.f32 %v3226_v42, %v3114_v10  ;;  %v3236_v63 = vadd.f32 %v3228_v44, %v3116_v30  ;;  %v3122_v18 = vmul.f32 %v2617_v33, %v1982_v17  ;;  %v3124_v15 = vmul.f32 %v2625_v34, %v2095_v21  ;;  %v1984_v16 = vpop.f32.mrb[43].mxu0  ;;  %v2097_v56 = vpop.f32.mrb[43].mxu1 }
 0x283   : > { %v3235_v12 = vadd.f32 %v3227_v32, %v3115_v26  ;;  %v3237_v6 = vadd.f32 %v3229_v45, %v3117_v0  ;;  %v3123_v37 = vmul.f32 %v2621_v36, %v1984_v16  ;;  %v3125_v29 = vmul.f32 %v2629_v7, %v2097_v56 }
 0x284   : > { %v3242_v13 = vadd.f32 %v3234_v48, %v3122_v18  ;;  %v3244_v40 = vadd.f32 %v3236_v63, %v3124_v15  ;;  %v2685_v32 = vrot.slane %v4378_v8, %v4183_v1  ;;  %v2713_v0 = vrot.slane %v4316_v25, %v5058_v24 }
 0x285   : > { %v3243_v62 = vadd.f32 %v3235_v12, %v3123_v37  ;;  %v3245_v58 = vadd.f32 %v3237_v6, %v3125_v29  ;;  %v2721_v8 = vrot.slane %v4316_v25, %v5059_v19  ;;  %v2717_v36 = vrot.slane %v4316_v25, %v4183_v1 }
 0x286   : > { %v2725_v7 = vrot.slane %v4316_v25, %v4186_v5  ;;  %v2745_v16 = vrot.slane %v4324_v31, %v5058_v24  ;;  %v2753_v56 = vrot.slane %v4324_v31, %v5059_v19  ;;  %v2757_v25 = vrot.slane %v4324_v31, %v4186_v5 }
 0x287   : > { %v1988_v35 = vpop.f32.mrb[44].mxu0  ;;  %v2101_v46 = vpop.f32.mrb[44].mxu1 }
 0x288   : > { %v3130_v61 = vmul.f32 %v2649_v38, %v1988_v35  ;;  %v3132_v11 = vmul.f32 %v2657_v50, %v2101_v46  ;;  %v1990_v22 = vpop.f32.mrb[45].mxu0  ;;  %v2103_v4 = vpop.f32.mrb[45].mxu1 }
 0x289   : > { %v3131_v49 = vmul.f32 %v2653_v27, %v1990_v22  ;;  %v3133_v41 = vmul.f32 %v2661_v55, %v2103_v4  ;;  %v1992_v42 = vpop.f32.mrb[46].mxu0  ;;  %v2105_v44 = vpop.f32.mrb[46].mxu1 }
 0x28a   : > { %v3250_v45 = vadd.f32 %v3242_v13, %v3130_v61  ;;  %v3252_v47 = vadd.f32 %v3244_v40, %v3132_v11  ;;  %v3138_v51 = vmul.f32 %v2681_v3, %v1992_v42  ;;  %v3140_v57 = vmul.f32 %v2689_v23, %v2105_v44  ;;  %v1994_v20 = vpop.f32.mrb[47].mxu0  ;;  %v2107_v39 = vpop.f32.mrb[47].mxu1 }
 0x28b   : > { %v3251_v9 = vadd.f32 %v3243_v62, %v3131_v49  ;;  %v3253_v10 = vadd.f32 %v3245_v58, %v3133_v41  ;;  %v3139_v30 = vmul.f32 %v2685_v32, %v1994_v20  ;;  %v3141_v52 = vmul.f32 %v2693_v14, %v2107_v39 }
 0x28c   : > { %v3258_v60 = vadd.f32 %v3250_v45, %v3138_v51  ;;  %v3260_v33 = vadd.f32 %v3252_v47, %v3140_v57  ;;  %v2749_v13 = vrot.slane %v4324_v31, %v4183_v1  ;;  %v2777_v23 = vrot.slane %v4318_v28, %v5058_v24 }
 0x28d   : > { %v3259_v34 = vadd.f32 %v3251_v9, %v3139_v30  ;;  %v3261_v26 = vadd.f32 %v3253_v10, %v3141_v52  ;;  %v2785_v31 = vrot.slane %v4318_v28, %v5059_v19  ;;  %v2781_v42 = vrot.slane %v4318_v28, %v4183_v1 }
 0x28e   : > { %v2789_v44 = vrot.slane %v4318_v28, %v4186_v5  ;;  %v2809_v51 = vrot.slane %v4326_v54, %v5058_v24  ;;  %v2817_v57 = vrot.slane %v4326_v54, %v5059_v19  ;;  %v2813_v30 = vrot.slane %v4326_v54, %v4183_v1 }
 0x28f   : > { %v1998_v17 = vpop.f32.mrb[48].mxu0  ;;  %v2111_v21 = vpop.f32.mrb[48].mxu1  ;;  %v2821_v28 = vrot.slane %v4326_v54, %v4186_v5  ;;  %v2849_v54 = vrot.slane %v4320_v2, %v5059_v19 }
 0x290   : > { %v3146_v48 = vmul.f32 %v2713_v0, %v1998_v17  ;;  %v3148_v63 = vmul.f32 %v2721_v8, %v2111_v21  ;;  %v2000_v18 = vpop.f32.mrb[49].mxu0  ;;  %v2113_v15 = vpop.f32.mrb[49].mxu1 }
 0x291   : > { %v3147_v12 = vmul.f32 %v2717_v36, %v2000_v18  ;;  %v3149_v6 = vmul.f32 %v2725_v7, %v2113_v15  ;;  %v2002_v37 = vpop.f32.mrb[50].mxu0  ;;  %v2115_v29 = vpop.f32.mrb[50].mxu1  ;;  %v2841_v15 = vrot.slane %v4320_v2, %v5058_v24 }
 0x292   : > { %v3266_v40 = vadd.f32 %v3258_v60, %v3146_v48  ;;  %v3268_v62 = vadd.f32 %v3260_v33, %v3148_v63  ;;  %v3154_v58 = vmul.f32 %v2745_v16, %v2002_v37  ;;  %v3156_v38 = vmul.f32 %v2753_v56, %v2115_v29  ;;  %v2004_v50 = vpop.f32.mrb[51].mxu0  ;;  %v2117_v35 = vpop.f32.mrb[51].mxu1 }
 0x293   : > { %v3267_v46 = vadd.f32 %v3259_v34, %v3147_v12  ;;  %v3269_v27 = vadd.f32 %v3261_v26, %v3149_v6  ;;  %v3155_v55 = vmul.f32 %v2749_v13, %v2004_v50  ;;  %v3157_v61 = vmul.f32 %v2757_v25, %v2117_v35 }
 0x294   : > { %v3274_v11 = vadd.f32 %v3266_v40, %v3154_v58  ;;  %v3276_v22 = vadd.f32 %v3268_v62, %v3156_v38  ;;  %v2845_v12 = vrot.slane %v4320_v2, %v4183_v1  ;;  %v2853_v6 = vrot.slane %v4320_v2, %v4186_v5 }
 0x295   : > { %v3275_v4 = vadd.f32 %v3267_v46, %v3155_v55  ;;  %v3277_v3 = vadd.f32 %v3269_v27, %v3157_v61  ;;  %v2873_v40 = vrot.slane %v4328_v59, %v5058_v24  ;;  %v2881_v62 = vrot.slane %v4328_v59, %v5059_v19 }
 0x296   : > { %v2877_v46 = vrot.slane %v4328_v59, %v4183_v1  ;;  %v2885_v2 = vrot.slane %v4328_v59, %v4186_v5  ;;  %v2913_v59 = vrot.slane %v4322_v53, %v5059_v19 }
 0x297   : > { %v2008_v49 = vpop.f32.mrb[52].mxu0  ;;  %v2121_v41 = vpop.f32.mrb[52].mxu1 }
 0x298   : > { %v3162_v32 = vmul.f32 %v2777_v23, %v2008_v49  ;;  %v3164_v14 = vmul.f32 %v2785_v31, %v2121_v41  ;;  %v2010_v45 = vpop.f32.mrb[53].mxu0  ;;  %v2123_v47 = vpop.f32.mrb[53].mxu1 }
 0x299   : > { %v3163_v20 = vmul.f32 %v2781_v42, %v2010_v45  ;;  %v3165_v39 = vmul.f32 %v2789_v44, %v2123_v47  ;;  %v2012_v9 = vpop.f32.mrb[54].mxu0  ;;  %v2125_v10 = vpop.f32.mrb[54].mxu1 }
 0x29a   : > { %v3282_v52 = vadd.f32 %v3274_v11, %v3162_v32  ;;  %v3284_v60 = vadd.f32 %v3276_v22, %v3164_v14  ;;  %v3170_v33 = vmul.f32 %v2809_v51, %v2012_v9  ;;  %v3172_v34 = vmul.f32 %v2817_v57, %v2125_v10  ;;  %v2014_v26 = vpop.f32.mrb[55].mxu0  ;;  %v2127_v0 = vpop.f32.mrb[55].mxu1 }
 0x29b   : > { %v3283_v8 = vadd.f32 %v3275_v4, %v3163_v20  ;;  %v3285_v17 = vadd.f32 %v3277_v3, %v3165_v39  ;;  %v3171_v21 = vmul.f32 %v2813_v30, %v2014_v26  ;;  %v3173_v36 = vmul.f32 %v2821_v28, %v2127_v0 }
 0x29c   : > { %v3290_v7 = vadd.f32 %v3282_v52, %v3170_v33  ;;  %v3292_v48 = vadd.f32 %v3284_v60, %v3172_v34  ;;  %v2905_v14 = vrot.slane %v4322_v53, %v5058_v24  ;;  %v2909_v51 = vrot.slane %v4322_v53, %v4183_v1 }
 0x29d   : > { %v3291_v63 = vadd.f32 %v3283_v8, %v3171_v21  ;;  %v3293_v18 = vadd.f32 %v3285_v17, %v3173_v36  ;;  %v2917_v57 = vrot.slane %v4322_v53, %v4186_v5  ;;  %v2937_v30 = vrot.slane %v5063_v43, %v5058_v24 }
 0x29e   : > { %v2945_v28 = vrot.slane %v5063_v43, %v5059_v19  ;;  %v2941_v26 = vrot.slane %v5063_v43, %v4183_v1  ;;  %v2949_v53 = vrot.slane %v5063_v43, %v4186_v5 }
 0x29f   : > { %v2018_v16 = vpop.f32.mrb[56].mxu0  ;;  %v2131_v56 = vpop.f32.mrb[56].mxu1 }
 0x2a0   : > { %v3178_v37 = vmul.f32 %v2841_v15, %v2018_v16  ;;  %v3180_v29 = vmul.f32 %v2849_v54, %v2131_v56  ;;  %v2020_v13 = vpop.f32.mrb[57].mxu0  ;;  %v2133_v25 = vpop.f32.mrb[57].mxu1 }
 0x2a1   : > { %v3179_v58 = vmul.f32 %v2845_v12, %v2020_v13  ;;  %v3181_v38 = vmul.f32 %v2853_v6, %v2133_v25  ;;  %v2022_v50 = vpop.f32.mrb[58].mxu0  ;;  %v2135_v35 = vpop.f32.mrb[58].mxu1 }
 0x2a2   : > { %v3298_v27 = vadd.f32 %v3290_v7, %v3178_v37  ;;  %v3300_v55 = vadd.f32 %v3292_v48, %v3180_v29  ;;  %v3186_v61 = vmul.f32 %v2873_v40, %v2022_v50  ;;  %v3188_v11 = vmul.f32 %v2881_v62, %v2135_v35  ;;  %v2024_v22 = vpop.f32.mrb[59].mxu0  ;;  %v2137_v4 = vpop.f32.mrb[59].mxu1 }
 0x2a3   : > { %v3299_v3 = vadd.f32 %v3291_v63, %v3179_v58  ;;  %v3301_v23 = vadd.f32 %v3293_v18, %v3181_v38  ;;  %v3187_v31 = vmul.f32 %v2877_v46, %v2024_v22  ;;  %v3189_v49 = vmul.f32 %v2885_v2, %v2137_v4 }
 0x2a4   : > { %v3306_v41 = vadd.f32 %v3298_v27, %v3186_v61  ;;  %v3308_v42 = vadd.f32 %v3300_v55, %v3188_v11 }
 0x2a5   : > { %v3307_v44 = vadd.f32 %v3299_v3, %v3187_v31  ;;  %v3309_v32 = vadd.f32 %v3301_v23, %v3189_v49 }
 0x2a7   : > { %v2028_v45 = vpop.f32.mrb[60].mxu0  ;;  %v2141_v47 = vpop.f32.mrb[60].mxu1 }
 0x2a8   : > { %v3194_v20 = vmul.f32 %v2905_v14, %v2028_v45  ;;  %v3196_v39 = vmul.f32 %v2913_v59, %v2141_v47  ;;  %v2030_v9 = vpop.f32.mrb[61].mxu0  ;;  %v2143_v10 = vpop.f32.mrb[61].mxu1 }
 0x2a9   : > { %v3195_v52 = vmul.f32 %v2909_v51, %v2030_v9  ;;  %v3197_v60 = vmul.f32 %v2917_v57, %v2143_v10  ;;  %v2032_v33 = vpop.f32.mrb[62].mxu0  ;;  %v2145_v34 = vpop.f32.mrb[62].mxu1 }
 0x2aa   : > { %v3314_v0 = vadd.f32 %v3306_v41, %v3194_v20  ;;  %v3316_v8 = vadd.f32 %v3308_v42, %v3196_v39  ;;  %v3202_v17 = vmul.f32 %v2937_v30, %v2032_v33  ;;  %v3204_v21 = vmul.f32 %v2945_v28, %v2145_v34  ;;  %v2034_v24 = vpop.f32.mrb[63].mxu0  ;;  %v2147_v36 = vpop.f32.mrb[63].mxu1 }
 0x2ab   : > { %v3315_v19 = vadd.f32 %v3307_v44, %v3195_v52  ;;  %v3317_v7 = vadd.f32 %v3309_v32, %v3197_v60  ;;  %v3203_v1 = vmul.f32 %v2941_v26, %v2034_v24  ;;  %v3205_v48 = vmul.f32 %v2949_v53, %v2147_v36 }
 0x2ac   : > { %v3322_v63 = vadd.f32 %v3314_v0, %v3202_v17  ;;  %v3324_v5 = vadd.f32 %v3316_v8, %v3204_v21 }
 0x2ad   : > { %v3323_v43 = vadd.f32 %v3315_v19, %v3203_v1  ;;  %v3325_v18 = vadd.f32 %v3317_v7, %v3205_v48 }
 0x2ae   : > { %3330 = vst [vmem:[%s4828_s20 + $0x20] sm:$0xff] %v3322_v63  ;;  %3332 = vst [vmem:[%s4828_s20 + $0x30] sm:$0xff] %v3324_v5 }
 0x2af   : > { %3331 = vst [vmem:[%s4828_s20 + $0x28] sm:$0xff] %v3323_v43  ;;  %3333 = vst [vmem:[%s4828_s20 + $0x38] sm:$0xff] %v3325_v18 }
 0x2b0   : > { %3685 = shalt.err (!%p3682_p6)
}
 0x2b1   : > { %s3686_s9 = scalar_lea.hbm %s4967_s18, 1024  ;;  %s3690_s17 = scalar_lea.hbm %s5020_s6, 8192 }
 0x2b2   : > { %p3687_p12 = scmp.ne.s32.totalorder %s4967_s18, %s3686_s9  ;;  %p3691_p4 = scmp.lt.u32.totalorder %s4967_s18, %s5020_s6 }
 0x2b3   : > { %p3692_p8 = scmp.lt.u32.totalorder %s3690_s17, %s3686_s9  ;;  %p3694_p10 = scmp.lt.u32.totalorder %s3686_s9, %s4967_s18 }
 0x2b4   : > { %p3688_p7 = pnand %p3687_p12, %p5064_p13 }
 0x2b5   : > { %p3693_p2 = por %p3692_p8, %p3691_p4 }
 0x2b6   : > { %p3689_p11 = pneg %p3688_p7 }
 0x2b7   : > { %p3695_p0 = por %p3694_p10, %p3693_p2 }
 0x2b9   : > { %p3696_p3 = pnand %p3695_p0, %p3689_p11 }
 0x2bb   : > { %3699 = shalt.err (!%p3696_p3)
}
 0x2bc   : > { %3520 = dma.vmem_to_hbm [thread:$0]  (%p5064_p13), %s4969_s7, 1024, %s4967_s18, %s3335_s25  }
 0x2bd PF: > { %p3542_p5 = scmp.ge.s32.totalorder %s3746_s24, 2  ;;  %s3361_s29 = sand.u32 1, %s3734_s21  }
 0x2be   : > { %p5065_p9 = scmp.ne.s32.totalorder %s5035_s28, 0  ;;  %s3362_s27 = scalar_lea.sflag [#allocation4], %s3361_s29 }
 0x2c0   : > { %p3534_p1 = pnand %p3542_p5, %p5065_p9 }
 0x2c2   : > { %3729 = dma.done.wait (!%p3534_p1), %s3362_s27, 1024  }
 0x2c3   : > { %3731 = vsyncadd (!%p3534_p1), %s3362_s27, 4294966272  ;;  %p21_p6 = scmp.ge.s32.totalorder %s3881_s12, 10   ;;  %s5066_s21 = smov %s3738_s22 }
 0x2c4   : > { %s5067_s22 = smov %s3742_s23  ;;  %s5068_s23 = smov %s3897_s16 }
 0x2c5   : > { %s5069_s24 = smov %s3881_s12  ;;  %23 = sbr.rel (!%p21_p6) target bundleno = 7 (0x7), region = 98 }
 0x2cc   :  { %3367 = vsyncpa [#allocation3], 1 }
 0x2cd   :  { %3369 = vsyncpa [#allocation3 + $0x1], 1 }
 0x2ce   :  { %3370 = vsyncpa [#allocation8], 1 }
 0x2cf   :  { %3371 = vsyncpa [#allocation4], 1 }
 0x2d0   :  { %3373 = vsyncpa [#allocation4 + $0x1], 1 }
 0x2d1   :  { %3374 = vsyncpa [#allocation5], 1 }
 0x2d2   :  { %3376 = vsyncpa [#allocation5 + $0x1], 1 }

</bundles_post_ra>
